<compile_context>
chip_gen: v7x
topology: tpu7x:2x2x1
jax: 0.10.0
libtpu: 0.0.40
codegen_flags: <defaults>
</compile_context>

<pallas_src>
import functools

import jax
import jax.numpy as jnp
from jax.experimental import pallas as pl
from jax.experimental.pallas import tpu as pltpu


# ------------------------------ fused kernel ------------------------------

def _encoder_layer_kernel(nhead, has_pos, x_ref, *refs):
    if has_pos:
        pos_ref, *refs = refs
    (wqkv_ref, wo_ref, ln1g_ref, ln1b_ref, ln2g_ref, ln2b_ref,
     w1_ref, b1_ref, w2_ref, b2_ref, o_ref) = refs

    Bb, L, E = x_ref.shape
    Dh = E // nhead
    M = Bb * L

    # Flatten batch into the matmul M dimension (free: L is a multiple of 8).
    x = x_ref[...].reshape(M, E)                          # (M, E) float32

    def layer_norm(v, g, b):
        mu = jnp.mean(v, axis=-1, keepdims=True)
        vc = v - mu
        var = jnp.mean(vc * vc, axis=-1, keepdims=True)
        return vc * jax.lax.rsqrt(var + 1e-5) * g + b     # torch eps = 1e-5

    # ---- LN1 + fused QKV projection (MHA bias=False; 1/sqrt(Dh) folded into Wq) ----
    y = layer_norm(x, ln1g_ref[...], ln1b_ref[...])
    w_qkv = wqkv_ref[...]                                 # (E, 3E) bf16
    if has_pos:
        qk_in = (y + pos_ref[...].reshape(M, E)).astype(jnp.bfloat16)
        qk = jnp.dot(qk_in, w_qkv[:, :2 * E], preferred_element_type=jnp.float32)
        q_all, k_all = qk[:, :E], qk[:, E:]
        v_all = jnp.dot(y.astype(jnp.bfloat16), w_qkv[:, 2 * E:],
                        preferred_element_type=jnp.float32)
    else:
        qkv = jnp.dot(y.astype(jnp.bfloat16), w_qkv,
                      preferred_element_type=jnp.float32)  # (M, 3E)
        q_all, k_all, v_all = qkv[:, :E], qkv[:, E:2 * E], qkv[:, 2 * E:]

    # ---- attention: small static loops over batch/heads; W_o fused per head ----
    w_o = wo_ref[...]                                     # (E, E) bf16
    batch_outs = []
    for b in range(Bb):
        rows = slice(b * L, (b + 1) * L)
        acc = jnp.zeros((L, E), jnp.float32)              # projected attn accumulator
        for h in range(nhead):
            c0 = h * Dh
            qh = q_all[rows, c0:c0 + Dh].astype(jnp.bfloat16)   # (L, Dh)
            kh = k_all[rows, c0:c0 + Dh].astype(jnp.bfloat16)
            vh = v_all[rows, c0:c0 + Dh].astype(jnp.bfloat16)
            s = jax.lax.dot_general(qh, kh, (((1,), (1,)), ((), ())),
                                    preferred_element_type=jnp.float32)  # (L, L)
            s = s - jnp.max(s, axis=-1, keepdims=True)
            p = jnp.exp(s)
            inv = pl.reciprocal(jnp.sum(p, axis=-1, keepdims=True), approx=False)
            # normalize AFTER P@V: scales (L, Dh) instead of (L, L)
            oh = jnp.dot(p.astype(jnp.bfloat16), vh,
                         preferred_element_type=jnp.float32) * inv       # (L, Dh)
            # fuse out-projection per head: (L, Dh) @ (Dh, E), no head concat
            acc = acc + jnp.dot(oh.astype(jnp.bfloat16), w_o[c0:c0 + Dh, :],
                                preferred_element_type=jnp.float32)
        batch_outs.append(acc)
    attn = batch_outs[0] if Bb == 1 else jnp.concatenate(batch_outs, axis=0)

    x1 = x + attn                                         # residual 1

    # ---- LN2 + FFN (Linear -> ReLU -> Linear) + residual 2 ----
    y2 = layer_norm(x1, ln2g_ref[...], ln2b_ref[...])
    hdn = jnp.dot(y2.astype(jnp.bfloat16), w1_ref[...],
                  preferred_element_type=jnp.float32) + b1_ref[...]
    hdn = jnp.maximum(hdn, 0.0)
    f = jnp.dot(hdn.astype(jnp.bfloat16), w2_ref[...],
                preferred_element_type=jnp.float32) + b2_ref[...]
    o_ref[...] = (x1 + f).reshape(Bb, L, E)               # free relayout back


# ------------------------------ host wrappers ------------------------------

def prepare_params(raw, nhead):
    """One-time conversion of PyTorch-layout params into kernel-ready layout:
    pre-transposed, bf16 weights, 1/sqrt(Dh) folded into the Q columns."""
    E = raw['in_proj_weight'].shape[1]
    Dh = E // nhead
    w_qkv = jnp.transpose(raw['in_proj_weight']).astype(jnp.float32)   # (E, 3E)
    col_scale = jnp.concatenate([
        jnp.full((E,), Dh ** -0.5, jnp.float32),
        jnp.ones((2 * E,), jnp.float32)], axis=0)
    return {
        'w_qkv': (w_qkv * col_scale[None, :]).astype(jnp.bfloat16),
        'w_o': jnp.transpose(raw['out_proj_weight']).astype(jnp.bfloat16),
        'ln1_g': raw['norm1_g'].reshape(1, E).astype(jnp.float32),
        'ln1_b': raw['norm1_b'].reshape(1, E).astype(jnp.float32),
        'ln2_g': raw['norm2_g'].reshape(1, E).astype(jnp.float32),
        'ln2_b': raw['norm2_b'].reshape(1, E).astype(jnp.float32),
        'w1': jnp.transpose(raw['linear1_w']).astype(jnp.bfloat16),     # (E, H)
        'b1': raw['linear1_b'].reshape(1, -1).astype(jnp.float32),
        'w2': jnp.transpose(raw['linear2_w']).astype(jnp.bfloat16),     # (H, E)
        'b2': raw['linear2_b'].reshape(1, E).astype(jnp.float32),
    }


def _default_batch_blocks(B):
    """2-way megacore batch split only on v7x (2 TensorCores/chip); a longer
    grid on v5e/v6e (1 TC) is pure serial per-step overhead."""
    try:
        kind = jax.devices()[0].device_kind.lower()
    except Exception:
        return 1
    if '7' in kind and B % 2 == 0:
        return 2
    return 1


def transformer_encoder_layer(x, kp, pos=None, *, nhead, num_batch_blocks=1):
    """x: (B, L, E) batch-first float32 activations (permute from PyTorch's
    (L, B, E) once at data-prep time, not per call). Returns (B, L, E) f32."""
    B, L, E = x.shape
    H = kp['w1'].shape[1]
    assert B % num_batch_blocks == 0
    Bb = B // num_batch_blocks
    has_pos = pos is not None

    in_specs = [pl.BlockSpec((Bb, L, E), lambda i: (i, 0, 0))]
    args = [x.astype(jnp.float32)]
    if has_pos:
        in_specs.append(pl.BlockSpec((Bb, L, E), lambda i: (i, 0, 0)))
        args.append(pos.astype(jnp.float32))
    in_specs += [
        pl.BlockSpec((E, 3 * E), lambda i: (0, 0)),   # w_qkv
        pl.BlockSpec((E, E),     lambda i: (0, 0)),   # w_o
        pl.BlockSpec((1, E),     lambda i: (0, 0)),   # ln1_g
        pl.BlockSpec((1, E),     lambda i: (0, 0)),   # ln1_b
        pl.BlockSpec((1, E),     lambda i: (0, 0)),   # ln2_g
        pl.BlockSpec((1, E),     lambda i: (0, 0)),   # ln2_b
        pl.BlockSpec((E, H),     lambda i: (0, 0)),   # w1
        pl.BlockSpec((1, H),     lambda i: (0, 0)),   # b1
        pl.BlockSpec((H, E),     lambda i: (0, 0)),   # w2
        pl.BlockSpec((1, E),     lambda i: (0, 0)),   # b2
    ]
    args += [kp['w_qkv'], kp['w_o'], kp['ln1_g'], kp['ln1_b'],
             kp['ln2_g'], kp['ln2_b'], kp['w1'], kp['b1'], kp['w2'], kp['b2']]

    return pl.pallas_call(
        functools.partial(_encoder_layer_kernel, nhead, has_pos),
        out_shape=jax.ShapeDtypeStruct((B, L, E), jnp.float32),
        grid=(num_batch_blocks,),
        in_specs=in_specs,
        out_specs=pl.BlockSpec((Bb, L, E), lambda i: (i, 0, 0)),
        compiler_params=pltpu.CompilerParams(
            dimension_semantics=("parallel",),
            vmem_limit_bytes=32 * 1024 * 1024),
    )(*args)


# ------------------------- pure-JAX reference check -------------------------

def reference_forward(src, raw, pos=None, *, nhead):
    """src: (L, B, E) seq-first, exactly the PyTorch module's semantics (f32)."""
    L, B, E = src.shape
    Dh = E // nhead
    x = src.astype(jnp.float32)

    def ln(v, g, b):
        mu = v.mean(-1, keepdims=True)
        vc = v - mu
        var = (vc * vc).mean(-1, keepdims=True)
        return vc * jax.lax.rsqrt(var + 1e-5) * g + b

    src2 = ln(x, raw['norm1_g'], raw['norm1_b'])
    qk = src2 if pos is None else src2 + pos
    Wq, Wk, Wv = jnp.split(raw['in_proj_weight'], 3, axis=0)
    q = (qk @ Wq.T) * (Dh ** -0.5)
    k = qk @ Wk.T
    v = src2 @ Wv.T
    q = q.reshape(L, B, nhead, Dh).transpose(1, 2, 0, 3)
    k = k.reshape(L, B, nhead, Dh).transpose(1, 2, 0, 3)
    v = v.reshape(L, B, nhead, Dh).transpose(1, 2, 0, 3)
    s = jnp.einsum('bhqd,bhkd->bhqk', q, k)
    p = jax.nn.softmax(s, axis=-1)
    o = jnp.einsum('bhqk,bhkd->bhqd', p, v)
    o = o.transpose(2, 0, 1, 3).reshape(L, B, E)
    x = x + o @ raw['out_proj_weight'].T
    src2 = ln(x, raw['norm2_g'], raw['norm2_b'])
    h = jnp.maximum(src2 @ raw['linear1_w'].T + raw['linear1_b'], 0.0)
    return x + h @ raw['linear2_w'].T + raw['linear2_b']


# ---------------------------------- main -----------------------------------

if __name__ == "__main__":
    L, B, E = 16, 2, 64        # seq, batch, d_model
    NHEAD = 4
    H = 128                    # dim_feedforward (small but lane-dense)

    key = jax.random.PRNGKey(0)
    ks = jax.random.split(key, 8)
    src = jax.random.normal(ks[0], (L, B, E), jnp.float32)   # PyTorch (L, B, E)

    def w(k, shape, scale=0.05):
        return (scale * jax.random.normal(k, shape)).astype(jnp.float32)

    raw = {
        'in_proj_weight': w(ks[1], (3 * E, E)),
        'out_proj_weight': w(ks[2], (E, E)),
        'linear1_w': w(ks[3], (H, E)),
        'linear1_b': w(ks[4], (H,)),
        'linear2_w': w(ks[5], (E, H)),
        'linear2_b': w(ks[6], (E,)),
        'norm1_g': jnp.ones((E,), jnp.float32),
        'norm1_b': jnp.zeros((E,), jnp.float32),
        'norm2_g': jnp.ones((E,), jnp.float32),
        'norm2_b': jnp.zeros((E,), jnp.float32),
    }

    kp = prepare_params(raw, NHEAD)

    # One-time data-prep permute to batch-first (hoisted out of the forward path).
    x_bf = jnp.transpose(src, (1, 0, 2))                     # (B, L, E)

    nb = _default_batch_blocks(B)                            # 2 on v7x, else 1
    fwd = jax.jit(functools.partial(transformer_encoder_layer,
                                    nhead=NHEAD, num_batch_blocks=nb))
    out = fwd(x_bf, kp)
    jax.block_until_ready(out)

    assert out.shape == (B, L, E) and out.dtype == jnp.float32
    assert bool(jnp.all(jnp.isfinite(out)))
    ref = reference_forward(src, raw, nhead=NHEAD)           # (L, B, E)
    err = float(jnp.max(jnp.abs(out - jnp.transpose(ref, (1, 0, 2)))))
    assert err < 5e-2, f"max abs err too large: {err}"
    print("KERNEL_OK")
</pallas_src>

<mosaic_0001>
module attributes {stable_mosaic.version = 11 : i64} {
  func.func @_encoder_layer_kernel(%arg0: i32, %arg1: memref<2x16x64xf32, #tpu.memory_space<vmem>>, %arg2: memref<64x192xbf16, #tpu.memory_space<vmem>>, %arg3: memref<64x64xbf16, #tpu.memory_space<vmem>>, %arg4: memref<1x64xf32, #tpu.memory_space<vmem>>, %arg5: memref<1x64xf32, #tpu.memory_space<vmem>>, %arg6: memref<1x64xf32, #tpu.memory_space<vmem>>, %arg7: memref<1x64xf32, #tpu.memory_space<vmem>>, %arg8: memref<64x128xbf16, #tpu.memory_space<vmem>>, %arg9: memref<1x128xf32, #tpu.memory_space<vmem>>, %arg10: memref<128x64xbf16, #tpu.memory_space<vmem>>, %arg11: memref<1x64xf32, #tpu.memory_space<vmem>>, %arg12: memref<2x16x64xf32, #tpu.memory_space<vmem>>) attributes {dimension_semantics = [#tpu.dimension_semantics<parallel>], iteration_bounds = array<i64: 1>, scalar_prefetch = 0 : i64, scratch_operands = 0 : i64, tpu.core_type = #tpu.core_type<tc>, window_params = [{transform_indices = @transform_0, window_bounds = array<i64: 2, 16, 64>}, {pipeline_mode = #tpu.pipeline_mode<synchronous>, transform_indices = @transform_1, window_bounds = array<i64: 64, 192>}, {pipeline_mode = #tpu.pipeline_mode<synchronous>, transform_indices = @transform_2, window_bounds = array<i64: 64, 64>}, {pipeline_mode = #tpu.pipeline_mode<synchronous>, transform_indices = @transform_3, window_bounds = array<i64: 1, 64>}, {pipeline_mode = #tpu.pipeline_mode<synchronous>, transform_indices = @transform_4, window_bounds = array<i64: 1, 64>}, {pipeline_mode = #tpu.pipeline_mode<synchronous>, transform_indices = @transform_5, window_bounds = array<i64: 1, 64>}, {pipeline_mode = #tpu.pipeline_mode<synchronous>, transform_indices = @transform_6, window_bounds = array<i64: 1, 64>}, {pipeline_mode = #tpu.pipeline_mode<synchronous>, transform_indices = @transform_7, window_bounds = array<i64: 64, 128>}, {pipeline_mode = #tpu.pipeline_mode<synchronous>, transform_indices = @transform_8, window_bounds = array<i64: 1, 128>}, {pipeline_mode = #tpu.pipeline_mode<synchronous>, transform_indices = @transform_9, window_bounds = array<i64: 128, 64>}, {pipeline_mode = #tpu.pipeline_mode<synchronous>, transform_indices = @transform_10, window_bounds = array<i64: 1, 64>}, {transform_indices = @transform_11, window_bounds = array<i64: 2, 16, 64>}]} {
    %c0 = arith.constant 0 : index
    %c0_0 = arith.constant 0 : index
    %c0_1 = arith.constant 0 : index
    %0 = vector.load %arg1[%c0, %c0_0, %c0_1] : memref<2x16x64xf32, #tpu.memory_space<vmem>>, vector<2x16x64xf32>
    %1 = vector.shape_cast %0 : vector<2x16x64xf32> to vector<32x64xf32>
    %c0_2 = arith.constant 0 : index
    %c0_3 = arith.constant 0 : index
    %2 = vector.load %arg4[%c0_2, %c0_3] : memref<1x64xf32, #tpu.memory_space<vmem>>, vector<1x64xf32>
    %c0_4 = arith.constant 0 : index
    %c0_5 = arith.constant 0 : index
    %3 = vector.load %arg5[%c0_4, %c0_5] : memref<1x64xf32, #tpu.memory_space<vmem>>, vector<1x64xf32>
    %cst = arith.constant dense<0.000000e+00> : vector<32xf32>
    %4 = vector.multi_reduction <add>, %1, %cst [1] : vector<32x64xf32> to vector<32xf32>
    %5 = vector.shape_cast %4 : vector<32xf32> to vector<32x1xf32>
    %cst_6 = arith.constant 6.400000e+01 : f32
    %6 = vector.broadcast %cst_6 : f32 to vector<32x1xf32>
    %7 = arith.divf %5, %6 : vector<32x1xf32>
    %8 = vector.broadcast %7 : vector<32x1xf32> to vector<32x64xf32>
    %9 = arith.subf %1, %8 : vector<32x64xf32>
    %10 = arith.mulf %9, %9 : vector<32x64xf32>
    %cst_7 = arith.constant dense<0.000000e+00> : vector<32xf32>
    %11 = vector.multi_reduction <add>, %10, %cst_7 [1] : vector<32x64xf32> to vector<32xf32>
    %12 = vector.shape_cast %11 : vector<32xf32> to vector<32x1xf32>
    %cst_8 = arith.constant 6.400000e+01 : f32
    %13 = vector.broadcast %cst_8 : f32 to vector<32x1xf32>
    %14 = arith.divf %12, %13 : vector<32x1xf32>
    %cst_9 = arith.constant 9.99999974E-6 : f32
    %15 = vector.broadcast %cst_9 : f32 to vector<32x1xf32>
    %16 = arith.addf %14, %15 : vector<32x1xf32>
    %17 = math.rsqrt %16 : vector<32x1xf32>
    %18 = vector.broadcast %17 : vector<32x1xf32> to vector<32x64xf32>
    %19 = arith.mulf %9, %18 : vector<32x64xf32>
    %20 = vector.broadcast %2 : vector<1x64xf32> to vector<32x64xf32>
    %21 = arith.mulf %19, %20 : vector<32x64xf32>
    %22 = vector.broadcast %3 : vector<1x64xf32> to vector<32x64xf32>
    %23 = arith.addf %21, %22 : vector<32x64xf32>
    %c0_10 = arith.constant 0 : index
    %c0_11 = arith.constant 0 : index
    %24 = vector.load %arg2[%c0_10, %c0_11] : memref<64x192xbf16, #tpu.memory_space<vmem>>, vector<64x192xbf16>
    %25 = arith.truncf %23 : vector<32x64xf32> to vector<32x64xbf16>
    %cst_12 = arith.constant dense<0.000000e+00> : vector<32x192xf32>
    %26 = tpu.matmul %25, %24, %cst_12 {dimension_numbers = #tpu.dot_dimension_numbers<[1], [0], [0], [1], [0, 0, 1, 1], [], []>} : vector<32x64xbf16>, vector<64x192xbf16>, vector<32x192xf32> -> vector<32x192xf32>
    %27 = vector.extract_strided_slice %26 {offsets = [0, 0], sizes = [32, 64], strides = [1, 1]} : vector<32x192xf32> to vector<32x64xf32>
    %28 = vector.extract_strided_slice %26 {offsets = [0, 64], sizes = [32, 64], strides = [1, 1]} : vector<32x192xf32> to vector<32x64xf32>
    %29 = vector.extract_strided_slice %26 {offsets = [0, 128], sizes = [32, 64], strides = [1, 1]} : vector<32x192xf32> to vector<32x64xf32>
    %c0_13 = arith.constant 0 : index
    %c0_14 = arith.constant 0 : index
    %30 = vector.load %arg3[%c0_13, %c0_14] : memref<64x64xbf16, #tpu.memory_space<vmem>>, vector<64x64xbf16>
    %cst_15 = arith.constant 0.000000e+00 : f32
    %31 = vector.broadcast %cst_15 : f32 to vector<16x64xf32>
    %32 = vector.extract_strided_slice %27 {offsets = [0, 0], sizes = [16, 16], strides = [1, 1]} : vector<32x64xf32> to vector<16x16xf32>
    %33 = arith.truncf %32 : vector<16x16xf32> to vector<16x16xbf16>
    %34 = vector.extract_strided_slice %28 {offsets = [0, 0], sizes = [16, 16], strides = [1, 1]} : vector<32x64xf32> to vector<16x16xf32>
    %35 = arith.truncf %34 : vector<16x16xf32> to vector<16x16xbf16>
    %36 = vector.extract_strided_slice %29 {offsets = [0, 0], sizes = [16, 16], strides = [1, 1]} : vector<32x64xf32> to vector<16x16xf32>
    %37 = arith.truncf %36 : vector<16x16xf32> to vector<16x16xbf16>
    %cst_16 = arith.constant dense<0.000000e+00> : vector<16x16xf32>
    %38 = tpu.matmul %33, %35, %cst_16 {dimension_numbers = #tpu.dot_dimension_numbers<[1], [1], [0], [0], [0, 0, 1, 0], [], []>} : vector<16x16xbf16>, vector<16x16xbf16>, vector<16x16xf32> -> vector<16x16xf32>
    %cst_17 = arith.constant dense<0xFF800000> : vector<16xf32>
    %39 = vector.multi_reduction <maximumf>, %38, %cst_17 [1] : vector<16x16xf32> to vector<16xf32>
    %40 = vector.shape_cast %39 : vector<16xf32> to vector<16x1xf32>
    %41 = vector.broadcast %40 : vector<16x1xf32> to vector<16x16xf32>
    %42 = arith.subf %38, %41 : vector<16x16xf32>
    %43 = math.exp %42 : vector<16x16xf32>
    %cst_18 = arith.constant dense<0.000000e+00> : vector<16xf32>
    %44 = vector.multi_reduction <add>, %43, %cst_18 [1] : vector<16x16xf32> to vector<16xf32>
    %45 = vector.shape_cast %44 : vector<16xf32> to vector<16x1xf32>
    %46 = tpu.reciprocal %45 : vector<16x1xf32> -> vector<16x1xf32>
    %47 = arith.truncf %43 : vector<16x16xf32> to vector<16x16xbf16>
    %cst_19 = arith.constant dense<0.000000e+00> : vector<16x16xf32>
    %48 = tpu.matmul %47, %37, %cst_19 {dimension_numbers = #tpu.dot_dimension_numbers<[1], [0], [0], [1], [0, 0, 1, 1], [], []>} : vector<16x16xbf16>, vector<16x16xbf16>, vector<16x16xf32> -> vector<16x16xf32>
    %49 = vector.broadcast %46 : vector<16x1xf32> to vector<16x16xf32>
    %50 = arith.mulf %48, %49 : vector<16x16xf32>
    %51 = arith.truncf %50 : vector<16x16xf32> to vector<16x16xbf16>
    %52 = vector.extract_strided_slice %30 {offsets = [0, 0], sizes = [16, 64], strides = [1, 1]} : vector<64x64xbf16> to vector<16x64xbf16>
    %cst_20 = arith.constant dense<0.000000e+00> : vector<16x64xf32>
    %53 = tpu.matmul %51, %52, %cst_20 {dimension_numbers = #tpu.dot_dimension_numbers<[1], [0], [0], [1], [0, 0, 1, 1], [], []>} : vector<16x16xbf16>, vector<16x64xbf16>, vector<16x64xf32> -> vector<16x64xf32>
    %54 = arith.addf %31, %53 : vector<16x64xf32>
    %55 = vector.extract_strided_slice %27 {offsets = [0, 16], sizes = [16, 16], strides = [1, 1]} : vector<32x64xf32> to vector<16x16xf32>
    %56 = arith.truncf %55 : vector<16x16xf32> to vector<16x16xbf16>
    %57 = vector.extract_strided_slice %28 {offsets = [0, 16], sizes = [16, 16], strides = [1, 1]} : vector<32x64xf32> to vector<16x16xf32>
    %58 = arith.truncf %57 : vector<16x16xf32> to vector<16x16xbf16>
    %59 = vector.extract_strided_slice %29 {offsets = [0, 16], sizes = [16, 16], strides = [1, 1]} : vector<32x64xf32> to vector<16x16xf32>
    %60 = arith.truncf %59 : vector<16x16xf32> to vector<16x16xbf16>
    %cst_21 = arith.constant dense<0.000000e+00> : vector<16x16xf32>
    %61 = tpu.matmul %56, %58, %cst_21 {dimension_numbers = #tpu.dot_dimension_numbers<[1], [1], [0], [0], [0, 0, 1, 0], [], []>} : vector<16x16xbf16>, vector<16x16xbf16>, vector<16x16xf32> -> vector<16x16xf32>
    %cst_22 = arith.constant dense<0xFF800000> : vector<16xf32>
    %62 = vector.multi_reduction <maximumf>, %61, %cst_22 [1] : vector<16x16xf32> to vector<16xf32>
    %63 = vector.shape_cast %62 : vector<16xf32> to vector<16x1xf32>
    %64 = vector.broadcast %63 : vector<16x1xf32> to vector<16x16xf32>
    %65 = arith.subf %61, %64 : vector<16x16xf32>
    %66 = math.exp %65 : vector<16x16xf32>
    %cst_23 = arith.constant dense<0.000000e+00> : vector<16xf32>
    %67 = vector.multi_reduction <add>, %66, %cst_23 [1] : vector<16x16xf32> to vector<16xf32>
    %68 = vector.shape_cast %67 : vector<16xf32> to vector<16x1xf32>
    %69 = tpu.reciprocal %68 : vector<16x1xf32> -> vector<16x1xf32>
    %70 = arith.truncf %66 : vector<16x16xf32> to vector<16x16xbf16>
    %cst_24 = arith.constant dense<0.000000e+00> : vector<16x16xf32>
    %71 = tpu.matmul %70, %60, %cst_24 {dimension_numbers = #tpu.dot_dimension_numbers<[1], [0], [0], [1], [0, 0, 1, 1], [], []>} : vector<16x16xbf16>, vector<16x16xbf16>, vector<16x16xf32> -> vector<16x16xf32>
    %72 = vector.broadcast %69 : vector<16x1xf32> to vector<16x16xf32>
    %73 = arith.mulf %71, %72 : vector<16x16xf32>
    %74 = arith.truncf %73 : vector<16x16xf32> to vector<16x16xbf16>
    %75 = vector.extract_strided_slice %30 {offsets = [16, 0], sizes = [16, 64], strides = [1, 1]} : vector<64x64xbf16> to vector<16x64xbf16>
    %cst_25 = arith.constant dense<0.000000e+00> : vector<16x64xf32>
    %76 = tpu.matmul %74, %75, %cst_25 {dimension_numbers = #tpu.dot_dimension_numbers<[1], [0], [0], [1], [0, 0, 1, 1], [], []>} : vector<16x16xbf16>, vector<16x64xbf16>, vector<16x64xf32> -> vector<16x64xf32>
    %77 = arith.addf %54, %76 : vector<16x64xf32>
    %78 = vector.extract_strided_slice %27 {offsets = [0, 32], sizes = [16, 16], strides = [1, 1]} : vector<32x64xf32> to vector<16x16xf32>
    %79 = arith.truncf %78 : vector<16x16xf32> to vector<16x16xbf16>
    %80 = vector.extract_strided_slice %28 {offsets = [0, 32], sizes = [16, 16], strides = [1, 1]} : vector<32x64xf32> to vector<16x16xf32>
    %81 = arith.truncf %80 : vector<16x16xf32> to vector<16x16xbf16>
    %82 = vector.extract_strided_slice %29 {offsets = [0, 32], sizes = [16, 16], strides = [1, 1]} : vector<32x64xf32> to vector<16x16xf32>
    %83 = arith.truncf %82 : vector<16x16xf32> to vector<16x16xbf16>
    %cst_26 = arith.constant dense<0.000000e+00> : vector<16x16xf32>
    %84 = tpu.matmul %79, %81, %cst_26 {dimension_numbers = #tpu.dot_dimension_numbers<[1], [1], [0], [0], [0, 0, 1, 0], [], []>} : vector<16x16xbf16>, vector<16x16xbf16>, vector<16x16xf32> -> vector<16x16xf32>
    %cst_27 = arith.constant dense<0xFF800000> : vector<16xf32>
    %85 = vector.multi_reduction <maximumf>, %84, %cst_27 [1] : vector<16x16xf32> to vector<16xf32>
    %86 = vector.shape_cast %85 : vector<16xf32> to vector<16x1xf32>
    %87 = vector.broadcast %86 : vector<16x1xf32> to vector<16x16xf32>
    %88 = arith.subf %84, %87 : vector<16x16xf32>
    %89 = math.exp %88 : vector<16x16xf32>
    %cst_28 = arith.constant dense<0.000000e+00> : vector<16xf32>
    %90 = vector.multi_reduction <add>, %89, %cst_28 [1] : vector<16x16xf32> to vector<16xf32>
    %91 = vector.shape_cast %90 : vector<16xf32> to vector<16x1xf32>
    %92 = tpu.reciprocal %91 : vector<16x1xf32> -> vector<16x1xf32>
    %93 = arith.truncf %89 : vector<16x16xf32> to vector<16x16xbf16>
    %cst_29 = arith.constant dense<0.000000e+00> : vector<16x16xf32>
    %94 = tpu.matmul %93, %83, %cst_29 {dimension_numbers = #tpu.dot_dimension_numbers<[1], [0], [0], [1], [0, 0, 1, 1], [], []>} : vector<16x16xbf16>, vector<16x16xbf16>, vector<16x16xf32> -> vector<16x16xf32>
    %95 = vector.broadcast %92 : vector<16x1xf32> to vector<16x16xf32>
    %96 = arith.mulf %94, %95 : vector<16x16xf32>
    %97 = arith.truncf %96 : vector<16x16xf32> to vector<16x16xbf16>
    %98 = vector.extract_strided_slice %30 {offsets = [32, 0], sizes = [16, 64], strides = [1, 1]} : vector<64x64xbf16> to vector<16x64xbf16>
    %cst_30 = arith.constant dense<0.000000e+00> : vector<16x64xf32>
    %99 = tpu.matmul %97, %98, %cst_30 {dimension_numbers = #tpu.dot_dimension_numbers<[1], [0], [0], [1], [0, 0, 1, 1], [], []>} : vector<16x16xbf16>, vector<16x64xbf16>, vector<16x64xf32> -> vector<16x64xf32>
    %100 = arith.addf %77, %99 : vector<16x64xf32>
    %101 = vector.extract_strided_slice %27 {offsets = [0, 48], sizes = [16, 16], strides = [1, 1]} : vector<32x64xf32> to vector<16x16xf32>
    %102 = arith.truncf %101 : vector<16x16xf32> to vector<16x16xbf16>
    %103 = vector.extract_strided_slice %28 {offsets = [0, 48], sizes = [16, 16], strides = [1, 1]} : vector<32x64xf32> to vector<16x16xf32>
    %104 = arith.truncf %103 : vector<16x16xf32> to vector<16x16xbf16>
    %105 = vector.extract_strided_slice %29 {offsets = [0, 48], sizes = [16, 16], strides = [1, 1]} : vector<32x64xf32> to vector<16x16xf32>
    %106 = arith.truncf %105 : vector<16x16xf32> to vector<16x16xbf16>
    %cst_31 = arith.constant dense<0.000000e+00> : vector<16x16xf32>
    %107 = tpu.matmul %102, %104, %cst_31 {dimension_numbers = #tpu.dot_dimension_numbers<[1], [1], [0], [0], [0, 0, 1, 0], [], []>} : vector<16x16xbf16>, vector<16x16xbf16>, vector<16x16xf32> -> vector<16x16xf32>
    %cst_32 = arith.constant dense<0xFF800000> : vector<16xf32>
    %108 = vector.multi_reduction <maximumf>, %107, %cst_32 [1] : vector<16x16xf32> to vector<16xf32>
    %109 = vector.shape_cast %108 : vector<16xf32> to vector<16x1xf32>
    %110 = vector.broadcast %109 : vector<16x1xf32> to vector<16x16xf32>
    %111 = arith.subf %107, %110 : vector<16x16xf32>
    %112 = math.exp %111 : vector<16x16xf32>
    %cst_33 = arith.constant dense<0.000000e+00> : vector<16xf32>
    %113 = vector.multi_reduction <add>, %112, %cst_33 [1] : vector<16x16xf32> to vector<16xf32>
    %114 = vector.shape_cast %113 : vector<16xf32> to vector<16x1xf32>
    %115 = tpu.reciprocal %114 : vector<16x1xf32> -> vector<16x1xf32>
    %116 = arith.truncf %112 : vector<16x16xf32> to vector<16x16xbf16>
    %cst_34 = arith.constant dense<0.000000e+00> : vector<16x16xf32>
    %117 = tpu.matmul %116, %106, %cst_34 {dimension_numbers = #tpu.dot_dimension_numbers<[1], [0], [0], [1], [0, 0, 1, 1], [], []>} : vector<16x16xbf16>, vector<16x16xbf16>, vector<16x16xf32> -> vector<16x16xf32>
    %118 = vector.broadcast %115 : vector<16x1xf32> to vector<16x16xf32>
    %119 = arith.mulf %117, %118 : vector<16x16xf32>
    %120 = arith.truncf %119 : vector<16x16xf32> to vector<16x16xbf16>
    %121 = vector.extract_strided_slice %30 {offsets = [48, 0], sizes = [16, 64], strides = [1, 1]} : vector<64x64xbf16> to vector<16x64xbf16>
    %cst_35 = arith.constant dense<0.000000e+00> : vector<16x64xf32>
    %122 = tpu.matmul %120, %121, %cst_35 {dimension_numbers = #tpu.dot_dimension_numbers<[1], [0], [0], [1], [0, 0, 1, 1], [], []>} : vector<16x16xbf16>, vector<16x64xbf16>, vector<16x64xf32> -> vector<16x64xf32>
    %123 = arith.addf %100, %122 : vector<16x64xf32>
    %cst_36 = arith.constant 0.000000e+00 : f32
    %124 = vector.broadcast %cst_36 : f32 to vector<16x64xf32>
    %125 = vector.extract_strided_slice %27 {offsets = [16, 0], sizes = [16, 16], strides = [1, 1]} : vector<32x64xf32> to vector<16x16xf32>
    %126 = arith.truncf %125 : vector<16x16xf32> to vector<16x16xbf16>
    %127 = vector.extract_strided_slice %28 {offsets = [16, 0], sizes = [16, 16], strides = [1, 1]} : vector<32x64xf32> to vector<16x16xf32>
    %128 = arith.truncf %127 : vector<16x16xf32> to vector<16x16xbf16>
    %129 = vector.extract_strided_slice %29 {offsets = [16, 0], sizes = [16, 16], strides = [1, 1]} : vector<32x64xf32> to vector<16x16xf32>
    %130 = arith.truncf %129 : vector<16x16xf32> to vector<16x16xbf16>
    %cst_37 = arith.constant dense<0.000000e+00> : vector<16x16xf32>
    %131 = tpu.matmul %126, %128, %cst_37 {dimension_numbers = #tpu.dot_dimension_numbers<[1], [1], [0], [0], [0, 0, 1, 0], [], []>} : vector<16x16xbf16>, vector<16x16xbf16>, vector<16x16xf32> -> vector<16x16xf32>
    %cst_38 = arith.constant dense<0xFF800000> : vector<16xf32>
    %132 = vector.multi_reduction <maximumf>, %131, %cst_38 [1] : vector<16x16xf32> to vector<16xf32>
    %133 = vector.shape_cast %132 : vector<16xf32> to vector<16x1xf32>
    %134 = vector.broadcast %133 : vector<16x1xf32> to vector<16x16xf32>
    %135 = arith.subf %131, %134 : vector<16x16xf32>
    %136 = math.exp %135 : vector<16x16xf32>
    %cst_39 = arith.constant dense<0.000000e+00> : vector<16xf32>
    %137 = vector.multi_reduction <add>, %136, %cst_39 [1] : vector<16x16xf32> to vector<16xf32>
    %138 = vector.shape_cast %137 : vector<16xf32> to vector<16x1xf32>
    %139 = tpu.reciprocal %138 : vector<16x1xf32> -> vector<16x1xf32>
    %140 = arith.truncf %136 : vector<16x16xf32> to vector<16x16xbf16>
    %cst_40 = arith.constant dense<0.000000e+00> : vector<16x16xf32>
    %141 = tpu.matmul %140, %130, %cst_40 {dimension_numbers = #tpu.dot_dimension_numbers<[1], [0], [0], [1], [0, 0, 1, 1], [], []>} : vector<16x16xbf16>, vector<16x16xbf16>, vector<16x16xf32> -> vector<16x16xf32>
    %142 = vector.broadcast %139 : vector<16x1xf32> to vector<16x16xf32>
    %143 = arith.mulf %141, %142 : vector<16x16xf32>
    %144 = arith.truncf %143 : vector<16x16xf32> to vector<16x16xbf16>
    %145 = vector.extract_strided_slice %30 {offsets = [0, 0], sizes = [16, 64], strides = [1, 1]} : vector<64x64xbf16> to vector<16x64xbf16>
    %cst_41 = arith.constant dense<0.000000e+00> : vector<16x64xf32>
    %146 = tpu.matmul %144, %145, %cst_41 {dimension_numbers = #tpu.dot_dimension_numbers<[1], [0], [0], [1], [0, 0, 1, 1], [], []>} : vector<16x16xbf16>, vector<16x64xbf16>, vector<16x64xf32> -> vector<16x64xf32>
    %147 = arith.addf %124, %146 : vector<16x64xf32>
    %148 = vector.extract_strided_slice %27 {offsets = [16, 16], sizes = [16, 16], strides = [1, 1]} : vector<32x64xf32> to vector<16x16xf32>
    %149 = arith.truncf %148 : vector<16x16xf32> to vector<16x16xbf16>
    %150 = vector.extract_strided_slice %28 {offsets = [16, 16], sizes = [16, 16], strides = [1, 1]} : vector<32x64xf32> to vector<16x16xf32>
    %151 = arith.truncf %150 : vector<16x16xf32> to vector<16x16xbf16>
    %152 = vector.extract_strided_slice %29 {offsets = [16, 16], sizes = [16, 16], strides = [1, 1]} : vector<32x64xf32> to vector<16x16xf32>
    %153 = arith.truncf %152 : vector<16x16xf32> to vector<16x16xbf16>
    %cst_42 = arith.constant dense<0.000000e+00> : vector<16x16xf32>
    %154 = tpu.matmul %149, %151, %cst_42 {dimension_numbers = #tpu.dot_dimension_numbers<[1], [1], [0], [0], [0, 0, 1, 0], [], []>} : vector<16x16xbf16>, vector<16x16xbf16>, vector<16x16xf32> -> vector<16x16xf32>
    %cst_43 = arith.constant dense<0xFF800000> : vector<16xf32>
    %155 = vector.multi_reduction <maximumf>, %154, %cst_43 [1] : vector<16x16xf32> to vector<16xf32>
    %156 = vector.shape_cast %155 : vector<16xf32> to vector<16x1xf32>
    %157 = vector.broadcast %156 : vector<16x1xf32> to vector<16x16xf32>
    %158 = arith.subf %154, %157 : vector<16x16xf32>
    %159 = math.exp %158 : vector<16x16xf32>
    %cst_44 = arith.constant dense<0.000000e+00> : vector<16xf32>
    %160 = vector.multi_reduction <add>, %159, %cst_44 [1] : vector<16x16xf32> to vector<16xf32>
    %161 = vector.shape_cast %160 : vector<16xf32> to vector<16x1xf32>
    %162 = tpu.reciprocal %161 : vector<16x1xf32> -> vector<16x1xf32>
    %163 = arith.truncf %159 : vector<16x16xf32> to vector<16x16xbf16>
    %cst_45 = arith.constant dense<0.000000e+00> : vector<16x16xf32>
    %164 = tpu.matmul %163, %153, %cst_45 {dimension_numbers = #tpu.dot_dimension_numbers<[1], [0], [0], [1], [0, 0, 1, 1], [], []>} : vector<16x16xbf16>, vector<16x16xbf16>, vector<16x16xf32> -> vector<16x16xf32>
    %165 = vector.broadcast %162 : vector<16x1xf32> to vector<16x16xf32>
    %166 = arith.mulf %164, %165 : vector<16x16xf32>
    %167 = arith.truncf %166 : vector<16x16xf32> to vector<16x16xbf16>
    %168 = vector.extract_strided_slice %30 {offsets = [16, 0], sizes = [16, 64], strides = [1, 1]} : vector<64x64xbf16> to vector<16x64xbf16>
    %cst_46 = arith.constant dense<0.000000e+00> : vector<16x64xf32>
    %169 = tpu.matmul %167, %168, %cst_46 {dimension_numbers = #tpu.dot_dimension_numbers<[1], [0], [0], [1], [0, 0, 1, 1], [], []>} : vector<16x16xbf16>, vector<16x64xbf16>, vector<16x64xf32> -> vector<16x64xf32>
    %170 = arith.addf %147, %169 : vector<16x64xf32>
    %171 = vector.extract_strided_slice %27 {offsets = [16, 32], sizes = [16, 16], strides = [1, 1]} : vector<32x64xf32> to vector<16x16xf32>
    %172 = arith.truncf %171 : vector<16x16xf32> to vector<16x16xbf16>
    %173 = vector.extract_strided_slice %28 {offsets = [16, 32], sizes = [16, 16], strides = [1, 1]} : vector<32x64xf32> to vector<16x16xf32>
    %174 = arith.truncf %173 : vector<16x16xf32> to vector<16x16xbf16>
    %175 = vector.extract_strided_slice %29 {offsets = [16, 32], sizes = [16, 16], strides = [1, 1]} : vector<32x64xf32> to vector<16x16xf32>
    %176 = arith.truncf %175 : vector<16x16xf32> to vector<16x16xbf16>
    %cst_47 = arith.constant dense<0.000000e+00> : vector<16x16xf32>
    %177 = tpu.matmul %172, %174, %cst_47 {dimension_numbers = #tpu.dot_dimension_numbers<[1], [1], [0], [0], [0, 0, 1, 0], [], []>} : vector<16x16xbf16>, vector<16x16xbf16>, vector<16x16xf32> -> vector<16x16xf32>
    %cst_48 = arith.constant dense<0xFF800000> : vector<16xf32>
    %178 = vector.multi_reduction <maximumf>, %177, %cst_48 [1] : vector<16x16xf32> to vector<16xf32>
    %179 = vector.shape_cast %178 : vector<16xf32> to vector<16x1xf32>
    %180 = vector.broadcast %179 : vector<16x1xf32> to vector<16x16xf32>
    %181 = arith.subf %177, %180 : vector<16x16xf32>
    %182 = math.exp %181 : vector<16x16xf32>
    %cst_49 = arith.constant dense<0.000000e+00> : vector<16xf32>
    %183 = vector.multi_reduction <add>, %182, %cst_49 [1] : vector<16x16xf32> to vector<16xf32>
    %184 = vector.shape_cast %183 : vector<16xf32> to vector<16x1xf32>
    %185 = tpu.reciprocal %184 : vector<16x1xf32> -> vector<16x1xf32>
    %186 = arith.truncf %182 : vector<16x16xf32> to vector<16x16xbf16>
    %cst_50 = arith.constant dense<0.000000e+00> : vector<16x16xf32>
    %187 = tpu.matmul %186, %176, %cst_50 {dimension_numbers = #tpu.dot_dimension_numbers<[1], [0], [0], [1], [0, 0, 1, 1], [], []>} : vector<16x16xbf16>, vector<16x16xbf16>, vector<16x16xf32> -> vector<16x16xf32>
    %188 = vector.broadcast %185 : vector<16x1xf32> to vector<16x16xf32>
    %189 = arith.mulf %187, %188 : vector<16x16xf32>
    %190 = arith.truncf %189 : vector<16x16xf32> to vector<16x16xbf16>
    %191 = vector.extract_strided_slice %30 {offsets = [32, 0], sizes = [16, 64], strides = [1, 1]} : vector<64x64xbf16> to vector<16x64xbf16>
    %cst_51 = arith.constant dense<0.000000e+00> : vector<16x64xf32>
    %192 = tpu.matmul %190, %191, %cst_51 {dimension_numbers = #tpu.dot_dimension_numbers<[1], [0], [0], [1], [0, 0, 1, 1], [], []>} : vector<16x16xbf16>, vector<16x64xbf16>, vector<16x64xf32> -> vector<16x64xf32>
    %193 = arith.addf %170, %192 : vector<16x64xf32>
    %194 = vector.extract_strided_slice %27 {offsets = [16, 48], sizes = [16, 16], strides = [1, 1]} : vector<32x64xf32> to vector<16x16xf32>
    %195 = arith.truncf %194 : vector<16x16xf32> to vector<16x16xbf16>
    %196 = vector.extract_strided_slice %28 {offsets = [16, 48], sizes = [16, 16], strides = [1, 1]} : vector<32x64xf32> to vector<16x16xf32>
    %197 = arith.truncf %196 : vector<16x16xf32> to vector<16x16xbf16>
    %198 = vector.extract_strided_slice %29 {offsets = [16, 48], sizes = [16, 16], strides = [1, 1]} : vector<32x64xf32> to vector<16x16xf32>
    %199 = arith.truncf %198 : vector<16x16xf32> to vector<16x16xbf16>
    %cst_52 = arith.constant dense<0.000000e+00> : vector<16x16xf32>
    %200 = tpu.matmul %195, %197, %cst_52 {dimension_numbers = #tpu.dot_dimension_numbers<[1], [1], [0], [0], [0, 0, 1, 0], [], []>} : vector<16x16xbf16>, vector<16x16xbf16>, vector<16x16xf32> -> vector<16x16xf32>
    %cst_53 = arith.constant dense<0xFF800000> : vector<16xf32>
    %201 = vector.multi_reduction <maximumf>, %200, %cst_53 [1] : vector<16x16xf32> to vector<16xf32>
    %202 = vector.shape_cast %201 : vector<16xf32> to vector<16x1xf32>
    %203 = vector.broadcast %202 : vector<16x1xf32> to vector<16x16xf32>
    %204 = arith.subf %200, %203 : vector<16x16xf32>
    %205 = math.exp %204 : vector<16x16xf32>
    %cst_54 = arith.constant dense<0.000000e+00> : vector<16xf32>
    %206 = vector.multi_reduction <add>, %205, %cst_54 [1] : vector<16x16xf32> to vector<16xf32>
    %207 = vector.shape_cast %206 : vector<16xf32> to vector<16x1xf32>
    %208 = tpu.reciprocal %207 : vector<16x1xf32> -> vector<16x1xf32>
    %209 = arith.truncf %205 : vector<16x16xf32> to vector<16x16xbf16>
    %cst_55 = arith.constant dense<0.000000e+00> : vector<16x16xf32>
    %210 = tpu.matmul %209, %199, %cst_55 {dimension_numbers = #tpu.dot_dimension_numbers<[1], [0], [0], [1], [0, 0, 1, 1], [], []>} : vector<16x16xbf16>, vector<16x16xbf16>, vector<16x16xf32> -> vector<16x16xf32>
    %211 = vector.broadcast %208 : vector<16x1xf32> to vector<16x16xf32>
    %212 = arith.mulf %210, %211 : vector<16x16xf32>
    %213 = arith.truncf %212 : vector<16x16xf32> to vector<16x16xbf16>
    %214 = vector.extract_strided_slice %30 {offsets = [48, 0], sizes = [16, 64], strides = [1, 1]} : vector<64x64xbf16> to vector<16x64xbf16>
    %cst_56 = arith.constant dense<0.000000e+00> : vector<16x64xf32>
    %215 = tpu.matmul %213, %214, %cst_56 {dimension_numbers = #tpu.dot_dimension_numbers<[1], [0], [0], [1], [0, 0, 1, 1], [], []>} : vector<16x16xbf16>, vector<16x64xbf16>, vector<16x64xf32> -> vector<16x64xf32>
    %216 = arith.addf %193, %215 : vector<16x64xf32>
    %217 = tpu.concatenate %123, %216 in 0 : vector<16x64xf32>, vector<16x64xf32> -> vector<32x64xf32>
    %218 = arith.addf %1, %217 : vector<32x64xf32>
    %c0_57 = arith.constant 0 : index
    %c0_58 = arith.constant 0 : index
    %219 = vector.load %arg6[%c0_57, %c0_58] : memref<1x64xf32, #tpu.memory_space<vmem>>, vector<1x64xf32>
    %c0_59 = arith.constant 0 : index
    %c0_60 = arith.constant 0 : index
    %220 = vector.load %arg7[%c0_59, %c0_60] : memref<1x64xf32, #tpu.memory_space<vmem>>, vector<1x64xf32>
    %cst_61 = arith.constant dense<0.000000e+00> : vector<32xf32>
    %221 = vector.multi_reduction <add>, %218, %cst_61 [1] : vector<32x64xf32> to vector<32xf32>
    %222 = vector.shape_cast %221 : vector<32xf32> to vector<32x1xf32>
    %cst_62 = arith.constant 6.400000e+01 : f32
    %223 = vector.broadcast %cst_62 : f32 to vector<32x1xf32>
    %224 = arith.divf %222, %223 : vector<32x1xf32>
    %225 = vector.broadcast %224 : vector<32x1xf32> to vector<32x64xf32>
    %226 = arith.subf %218, %225 : vector<32x64xf32>
    %227 = arith.mulf %226, %226 : vector<32x64xf32>
    %cst_63 = arith.constant dense<0.000000e+00> : vector<32xf32>
    %228 = vector.multi_reduction <add>, %227, %cst_63 [1] : vector<32x64xf32> to vector<32xf32>
    %229 = vector.shape_cast %228 : vector<32xf32> to vector<32x1xf32>
    %cst_64 = arith.constant 6.400000e+01 : f32
    %230 = vector.broadcast %cst_64 : f32 to vector<32x1xf32>
    %231 = arith.divf %229, %230 : vector<32x1xf32>
    %cst_65 = arith.constant 9.99999974E-6 : f32
    %232 = vector.broadcast %cst_65 : f32 to vector<32x1xf32>
    %233 = arith.addf %231, %232 : vector<32x1xf32>
    %234 = math.rsqrt %233 : vector<32x1xf32>
    %235 = vector.broadcast %234 : vector<32x1xf32> to vector<32x64xf32>
    %236 = arith.mulf %226, %235 : vector<32x64xf32>
    %237 = vector.broadcast %219 : vector<1x64xf32> to vector<32x64xf32>
    %238 = arith.mulf %236, %237 : vector<32x64xf32>
    %239 = vector.broadcast %220 : vector<1x64xf32> to vector<32x64xf32>
    %240 = arith.addf %238, %239 : vector<32x64xf32>
    %241 = arith.truncf %240 : vector<32x64xf32> to vector<32x64xbf16>
    %c0_66 = arith.constant 0 : index
    %c0_67 = arith.constant 0 : index
    %242 = vector.load %arg8[%c0_66, %c0_67] : memref<64x128xbf16, #tpu.memory_space<vmem>>, vector<64x128xbf16>
    %cst_68 = arith.constant dense<0.000000e+00> : vector<32x128xf32>
    %243 = tpu.matmul %241, %242, %cst_68 {dimension_numbers = #tpu.dot_dimension_numbers<[1], [0], [0], [1], [0, 0, 1, 1], [], []>} : vector<32x64xbf16>, vector<64x128xbf16>, vector<32x128xf32> -> vector<32x128xf32>
    %c0_69 = arith.constant 0 : index
    %c0_70 = arith.constant 0 : index
    %244 = vector.load %arg9[%c0_69, %c0_70] : memref<1x128xf32, #tpu.memory_space<vmem>>, vector<1x128xf32>
    %245 = vector.broadcast %244 : vector<1x128xf32> to vector<32x128xf32>
    %246 = arith.addf %243, %245 : vector<32x128xf32>
    %cst_71 = arith.constant 0.000000e+00 : f32
    %247 = vector.broadcast %cst_71 : f32 to vector<32x128xf32>
    %248 = arith.maximumf %246, %247 : vector<32x128xf32>
    %249 = arith.truncf %248 : vector<32x128xf32> to vector<32x128xbf16>
    %c0_72 = arith.constant 0 : index
    %c0_73 = arith.constant 0 : index
    %250 = vector.load %arg10[%c0_72, %c0_73] : memref<128x64xbf16, #tpu.memory_space<vmem>>, vector<128x64xbf16>
    %cst_74 = arith.constant dense<0.000000e+00> : vector<32x64xf32>
    %251 = tpu.matmul %249, %250, %cst_74 {dimension_numbers = #tpu.dot_dimension_numbers<[1], [0], [0], [1], [0, 0, 1, 1], [], []>} : vector<32x128xbf16>, vector<128x64xbf16>, vector<32x64xf32> -> vector<32x64xf32>
    %c0_75 = arith.constant 0 : index
    %c0_76 = arith.constant 0 : index
    %252 = vector.load %arg11[%c0_75, %c0_76] : memref<1x64xf32, #tpu.memory_space<vmem>>, vector<1x64xf32>
    %253 = vector.broadcast %252 : vector<1x64xf32> to vector<32x64xf32>
    %254 = arith.addf %251, %253 : vector<32x64xf32>
    %255 = arith.addf %218, %254 : vector<32x64xf32>
    %256 = vector.shape_cast %255 : vector<32x64xf32> to vector<2x16x64xf32>
    %c0_77 = arith.constant 0 : index
    %c0_78 = arith.constant 0 : index
    %c0_79 = arith.constant 0 : index
    %257 = vector.load %arg12[%c0_77, %c0_78, %c0_79] : memref<2x16x64xf32, #tpu.memory_space<vmem>>, vector<2x16x64xf32>
    tpu.vector_store %arg12[%c0_77, %c0_78, %c0_79], %256 {strides = array<i32>} : memref<2x16x64xf32, #tpu.memory_space<vmem>>, vector<2x16x64xf32>,
    return
  }
  func.func @transform_0(%arg0: i32) -> (i32, i32, i32) {
    %c0_i32 = arith.constant 0 : i32
    %c0_i32_0 = arith.constant 0 : i32
    %c0_i32_1 = arith.constant 0 : i32
    return %arg0, %c0_i32, %c0_i32_0 : i32, i32, i32
  }
  func.func @transform_1(%arg0: i32) -> (i32, i32) {
    %c0_i32 = arith.constant 0 : i32
    %c0_i32_0 = arith.constant 0 : i32
    %c0_i32_1 = arith.constant 0 : i32
    return %c0_i32, %c0_i32_0 : i32, i32
  }
  func.func @transform_2(%arg0: i32) -> (i32, i32) {
    %c0_i32 = arith.constant 0 : i32
    %c0_i32_0 = arith.constant 0 : i32
    %c0_i32_1 = arith.constant 0 : i32
    return %c0_i32, %c0_i32_0 : i32, i32
  }
  func.func @transform_3(%arg0: i32) -> (i32, i32) {
    %c0_i32 = arith.constant 0 : i32
    %c0_i32_0 = arith.constant 0 : i32
    %c0_i32_1 = arith.constant 0 : i32
    return %c0_i32, %c0_i32_0 : i32, i32
  }
  func.func @transform_4(%arg0: i32) -> (i32, i32) {
    %c0_i32 = arith.constant 0 : i32
    %c0_i32_0 = arith.constant 0 : i32
    %c0_i32_1 = arith.constant 0 : i32
    return %c0_i32, %c0_i32_0 : i32, i32
  }
  func.func @transform_5(%arg0: i32) -> (i32, i32) {
    %c0_i32 = arith.constant 0 : i32
    %c0_i32_0 = arith.constant 0 : i32
    %c0_i32_1 = arith.constant 0 : i32
    return %c0_i32, %c0_i32_0 : i32, i32
  }
  func.func @transform_6(%arg0: i32) -> (i32, i32) {
    %c0_i32 = arith.constant 0 : i32
    %c0_i32_0 = arith.constant 0 : i32
    %c0_i32_1 = arith.constant 0 : i32
    return %c0_i32, %c0_i32_0 : i32, i32
  }
  func.func @transform_7(%arg0: i32) -> (i32, i32) {
    %c0_i32 = arith.constant 0 : i32
    %c0_i32_0 = arith.constant 0 : i32
    %c0_i32_1 = arith.constant 0 : i32
    return %c0_i32, %c0_i32_0 : i32, i32
  }
  func.func @transform_8(%arg0: i32) -> (i32, i32) {
    %c0_i32 = arith.constant 0 : i32
    %c0_i32_0 = arith.constant 0 : i32
    %c0_i32_1 = arith.constant 0 : i32
    return %c0_i32, %c0_i32_0 : i32, i32
  }
  func.func @transform_9(%arg0: i32) -> (i32, i32) {
    %c0_i32 = arith.constant 0 : i32
    %c0_i32_0 = arith.constant 0 : i32
    %c0_i32_1 = arith.constant 0 : i32
    return %c0_i32, %c0_i32_0 : i32, i32
  }
  func.func @transform_10(%arg0: i32) -> (i32, i32) {
    %c0_i32 = arith.constant 0 : i32
    %c0_i32_0 = arith.constant 0 : i32
    %c0_i32_1 = arith.constant 0 : i32
    return %c0_i32, %c0_i32_0 : i32, i32
  }
  func.func @transform_11(%arg0: i32) -> (i32, i32, i32) {
    %c0_i32 = arith.constant 0 : i32
    %c0_i32_0 = arith.constant 0 : i32
    %c0_i32_1 = arith.constant 0 : i32
    return %arg0, %c0_i32, %c0_i32_0 : i32, i32, i32
  }
}

</mosaic_0001>

<bundles_post_ra>
// kernel: transformer_encoder_layer.1
= control target key start
LH: loop header
LB: loop body
LE: loop exit
PB: predicated region body
PF: predicated region fallthrough
CT: control target
= control target key end

     0   :  { %16 = vsyncpa [#allocation3], 0  ;;  %s3095_s0 = inlined_call_operand.vmem [shape: f32[2,16,64], index: 0, kind: input, shape index: {}]   ;;  %s3096_s1 = inlined_call_operand.vmem [shape: bf16[64,192], index: 1, kind: input, shape index: {}]   ;;  %s3097_s2 = inlined_call_operand.vmem [shape: bf16[64,64], index: 2, kind: input, shape index: {}]   ;;  %s3098_s3 = inlined_call_operand.vmem [shape: f32[1,64], index: 3, kind: input, shape index: {}]   ;;  %s3099_s4 = inlined_call_operand.vmem [shape: f32[1,64], index: 4, kind: input, shape index: {}]   ;;  %s3100_s5 = inlined_call_operand.hbm [shape: f32[1,64], index: 5, kind: input, shape index: {}]   ;;  %s3101_s6 = inlined_call_operand.hbm [shape: f32[1,64], index: 6, kind: input, shape index: {}]   ;;  %s3102_s7 = inlined_call_operand.hbm [shape: bf16[64,128], index: 7, kind: input, shape index: {}]   ;;  %s3103_s8 = inlined_call_operand.hbm [shape: f32[1,128], index: 8, kind: input, shape index: {}]   ;;  %s3104_s9 = inlined_call_operand.vmem [shape: bf16[128,64], index: 9, kind: input, shape index: {}]   ;;  %s3105_s10 = inlined_call_operand.hbm [shape: f32[1,64], index: 10, kind: input, shape index: {}]   ;;  %s3106_s11 = inlined_call_operand.hbm [shape: f32[2,16,64], index: 11, kind: output, shape index: {}]  }
   0x1   :  { %17 = vsyncpa [#allocation6], 0 }
   0x2   :  { %18 = vsyncpa [#allocation9], 0 }
   0x3   :  { %19 = vsyncpa [#allocation4], 0  ;;  %s2560_s17 = smov [#allocation5]   ;;  %s2561_s19 = smov [#allocation8]  }
   0x4   :  { %s46_s18 = sshll.u32 %s2560_s17, 4  ;;  %s68_s20 = sshll.u32 %s2561_s19, 4  ;;  %s47_s18 = int_to_ptr.vmem [resolvable:$true] %s46_s18  ;;  %s69_s20 = int_to_ptr.vmem [resolvable:$true] %s68_s20 }
   0x5   :  { %s2420_s23 = scalar_lea.hbm %s3101_s6, 16 }
   0x6   :  { %p2421_p0 = scmp.ne.s32.totalorder %s3101_s6, %s2420_s23  ;;  %p2424_p1 = scmp.lt.u32.totalorder %s2420_s23, %s3101_s6 }
   0x8   :  { %p2426_p2 = pnand %p2424_p1, %p2421_p0 }
   0xa   :  { %2429 = shalt.err (!%p2426_p2)
}
   0xb   :  { %s2430_s28 = scalar_lea.vmem %s47_s18, 16  ;;  %s2434_s29 = scalar_lea.vmem %s47_s18, 32 }
   0xc   :  { %p2431_p3 = scmp.ne.s32.totalorder %s47_s18, %s2430_s28  ;;  %p2435_p4 = scmp.lt.s32.totalorder %s47_s18, %s47_s18 }
   0xd   :  { %p2436_p5 = scmp.lt.s32.totalorder %s2434_s29, %s2430_s28 }
   0xf   :  { %p2437_p6 = por %p2436_p5, %p2435_p4 }
  0x11   :  { %p2438_p7 = pnand %p2437_p6, %p2431_p3 }
  0x13   :  { %2441 = shalt.err (!%p2438_p7)
}
  0x14   :  { %49 = dma.hbm_to_vmem [thread:$0]  %s3101_s6, 16, %s47_s18, [#allocation6]  }
  0x15   :  { %s2442_s15 = scalar_lea.hbm %s3103_s8, 16 }
  0x16   :  { %p2443_p8 = scmp.ne.s32.totalorder %s3103_s8, %s2442_s15  ;;  %p2446_p9 = scmp.lt.u32.totalorder %s2442_s15, %s3103_s8 }
  0x18   :  { %p2448_p10 = pnand %p2446_p9, %p2443_p8 }
  0x1a   :  { %2451 = shalt.err (!%p2448_p10)
}
  0x1b   :  { %s2452_s22 = scalar_lea.vmem %s69_s20, 16  ;;  %s2456_s23 = scalar_lea.vmem %s69_s20, 32 }
  0x1c   :  { %p2453_p11 = scmp.ne.s32.totalorder %s69_s20, %s2452_s22  ;;  %p2457_p12 = scmp.lt.s32.totalorder %s69_s20, %s69_s20 }
  0x1d   :  { %p2458_p13 = scmp.lt.s32.totalorder %s2456_s23, %s2452_s22 }
  0x1f   :  { %p2459_p0 = por %p2458_p13, %p2457_p12 }
  0x21   :  { %p2460_p1 = pnand %p2459_p0, %p2453_p11 }
  0x23   :  { %2463 = shalt.err (!%p2460_p1)
}
  0x24   :  { %71 = dma.hbm_to_vmem [thread:$0]  %s3103_s8, 16, %s69_s20, [#allocation9]  }
  0x25   :  { %s2562_s24 = smov [#allocation2]   ;;  %s2563_s26 = smov [#allocation7]  }
  0x26   :  { %s36_s25 = sshll.u32 %s2562_s24, 4  ;;  %s55_s27 = sshll.u32 %s2563_s26, 4  ;;  %s37_s25 = int_to_ptr.vmem [resolvable:$true] %s36_s25  ;;  %s2663_s27 = int_to_ptr.vmem [resolvable:$true] %s55_s27 }
  0x27   :  { %s2464_s30 = scalar_lea.hbm %s3100_s5, 16 }
  0x28   :  { %p2465_p2 = scmp.ne.s32.totalorder %s3100_s5, %s2464_s30  ;;  %p2468_p3 = scmp.lt.u32.totalorder %s2464_s30, %s3100_s5 }
  0x2a   :  { %p2470_p4 = pnand %p2468_p3, %p2465_p2 }
  0x2c   :  { %2473 = shalt.err (!%p2470_p4)
}
  0x2d   :  { %s2474_s8 = scalar_lea.vmem %s37_s25, 16  ;;  %s2478_s20 = scalar_lea.vmem %s37_s25, 32 }
  0x2e   :  { %p2475_p5 = scmp.ne.s32.totalorder %s37_s25, %s2474_s8  ;;  %p2479_p6 = scmp.lt.s32.totalorder %s37_s25, %s37_s25 }
  0x2f   :  { %p2480_p7 = scmp.lt.s32.totalorder %s2478_s20, %s2474_s8 }
  0x31   :  { %p2481_p8 = por %p2480_p7, %p2479_p6 }
  0x33   :  { %p2482_p9 = pnand %p2481_p8, %p2475_p5 }
  0x35   :  { %2485 = shalt.err (!%p2482_p9)
}
  0x36   :  { %39 = dma.hbm_to_vmem [thread:$0]  %s3100_s5, 16, %s37_s25, [#allocation3]  }
  0x37   :  { %s2486_s22 = scalar_lea.hbm %s3102_s7, 512 }
  0x38   :  { %p2487_p10 = scmp.ne.s32.totalorder %s3102_s7, %s2486_s22  ;;  %p2490_p11 = scmp.lt.u32.totalorder %s2486_s22, %s3102_s7 }
  0x3a   :  { %p2492_p12 = pnand %p2490_p11, %p2487_p10 }
  0x3c   :  { %2495 = shalt.err (!%p2492_p12)
}
  0x3d   :  { %s2496_s26 = scalar_lea.vmem %s2663_s27, 512  ;;  %p2501_p0 = scmp.lt.s32.totalorder %s2663_s27, %s2663_s27 }
  0x3e   :  { %p2497_p13 = scmp.ne.s32.totalorder %s2663_s27, %s2496_s26  ;;  %p2502_p1 = scmp.lt.s32.totalorder %s2496_s26, %s2496_s26 }
  0x40   :  { %p2503_p2 = por %p2502_p1, %p2501_p0 }
  0x42   :  { %p2504_p3 = pnand %p2503_p2, %p2497_p13 }
  0x44   :  { %2507 = shalt.err (!%p2504_p3)
}
  0x45   :  { %s2564_s5 = smov 64   ;;  %s2565_s25 = smov 4  }
  0x46   :  { %61 = dma.hbm_to_vmem [thread:$0]  %s3102_s7, 512, %s2663_s27, [#allocation6], %s2564_s5, %s2564_s5, %s2565_s25  }
  0x47   :  { %s2566_s30 = smov [#allocation10]   ;;  %s2508_s15 = scalar_lea.hbm %s3105_s10, 16 }
  0x48   :  { %s80_s12 = sshll.u32 %s2566_s30, 4  ;;  %p2509_p4 = scmp.ne.s32.totalorder %s3105_s10, %s2508_s15  ;;  %s81_s12 = int_to_ptr.vmem [resolvable:$true] %s80_s12 }
  0x49   :  { %p2512_p5 = scmp.lt.u32.totalorder %s2508_s15, %s3105_s10 }
  0x4b   :  { %p2514_p6 = pnand %p2512_p5, %p2509_p4 }
  0x4d   :  { %2517 = shalt.err (!%p2514_p6)
}
  0x4e   :  { %s2518_s19 = scalar_lea.vmem %s81_s12, 16  ;;  %s2522_s7 = scalar_lea.vmem %s81_s12, 32 }
  0x4f   :  { %p2519_p7 = scmp.ne.s32.totalorder %s81_s12, %s2518_s19  ;;  %p2523_p8 = scmp.lt.s32.totalorder %s81_s12, %s81_s12 }
  0x50   :  { %p2524_p9 = scmp.lt.s32.totalorder %s2522_s7, %s2518_s19 }
  0x52   :  { %p2525_p10 = por %p2524_p9, %p2523_p8 }
  0x54   :  { %p2526_p11 = pnand %p2525_p10, %p2519_p7 }
  0x56   :  { %2529 = shalt.err (!%p2526_p11)
}
  0x57   :  { %83 = dma.hbm_to_vmem [thread:$0]  %s3105_s10, 16, %s81_s12, [#allocation9]  }
  0x58   :  { %2552 = dma.done.wait [#allocation3], 16  }
  0x59   :  { %2553 = vsyncadd [#allocation3], 4294967280 }
  0x5a   :  { %2554 = dma.done.wait [#allocation6], 528  }
  0x5b   :  { %2555 = vsyncadd [#allocation6], 4294966768 }
  0x5c   :  { %2556 = dma.done.wait [#allocation9], 32  }
  0x5d   :  { %2557 = vsyncadd [#allocation9], 4294967264  ;;  %vm106_vm0 = vcmask 523264   ;;  %v100_v0 = vld [vmem:[%s3095_s0] sm:$0xff]  ;;  %v101_v1 = vld [vmem:[%s3095_s0 + $0x8] sm:$0xff]  ;;  %v2567_v28 = vmov 0  }
  0x5e   :  { %v107_v2 = vsel %vm106_vm0, %v100_v0, 0.0  ;;  %v110_v3 = vsel %vm106_vm0, %v101_v1, 0.0  ;;  %v102_v4 = vld [vmem:[%s3095_s0 + $0x10] sm:$0xff]  ;;  %v103_v15 = vld [vmem:[%s3095_s0 + $0x18] sm:$0xff]  ;;  %v2308_v18 = vld [vmem:[%s3096_s1 + $0x4] ss:$8 sps:$4 sm:$0xff]   ;;  %268 = vmatprep.mubr.bf16.mxu0 %v2567_v28  ;;  %278 = vmatprep.mubr.bf16.mxu1 %v2567_v28 }
  0x5f   :  { %108 = vadd.xlane.f32.xlu0 %v107_v2  ;;  %v113_v5 = vsel %vm106_vm0, %v102_v4, 0.0  ;;  %v116_v17 = vsel %vm106_vm0, %v103_v15, 0.0  ;;  %v2310_v19 = vld [vmem:[%s3096_s1] ss:$8 sps:$4 sm:$0xff]   ;;  %236 = vmatprep.subr.bf16.mxu0 %v2308_v18  ;;  %v2311_v20 = vld [vmem:[%s3096_s1 + $0x14] ss:$8 sps:$4 sm:$0xff]  }
  0x60   :  { %2281 = vmatprep.subr.bf16.mxu1 %v2308_v18  ;;  %237 = vmatpush1.bf16.msra.mxu0 %v2310_v19  ;;  %v2313_v21 = vld [vmem:[%s3096_s1 + $0x10] ss:$8 sps:$4 sm:$0xff]   ;;  %v2314_v22 = vld [vmem:[%s3096_s1 + $0x24] ss:$8 sps:$4 sm:$0xff]   ;;  %v2316_v23 = vld [vmem:[%s3096_s1 + $0x20] ss:$8 sps:$4 sm:$0xff]  }
  0x61   :  { %2285 = vmatpush1.bf16.msra.mxu1 %v2310_v19  ;;  %238 = vmatprep.subr.bf16.mxu0 %v2311_v20  ;;  %v2317_v24 = vld [vmem:[%s3096_s1 + $0x34] ss:$8 sps:$4 sm:$0xff]   ;;  %v2319_v27 = vld [vmem:[%s3096_s1 + $0x30] ss:$8 sps:$4 sm:$0xff]   ;;  %v1983_v45 = vld [vmem:[%s3098_s3] ss:$0 sm:$0xff] }
  0x62   :  { %2282 = vmatprep.subr.bf16.mxu1 %v2311_v20  ;;  %v1984_v49 = vld [vmem:[%s3099_s4] ss:$0 sm:$0xff]  ;;  %vm2569_vm1 = vmmov 0   ;;  %s2570_s3 = smov 112   ;;  %vm302_vm2 = vcmask 130048   ;;  %s2571_s4 = smov 48  }
  0x63   :  { %111 = vadd.xlane.f32.xlu0 %v110_v3  ;;  %s2572_s10 = smov 96   ;;  %s2573_s24 = smov 32  }
  0x64   :  { %239 = vmatpush1.bf16.msra.mxu0 %v2313_v21  ;;  %s2574_s26 = smov 16   ;;  %s2575_s25 = smov 80  }
  0x65   :  { %2286 = vmatpush1.bf16.msra.mxu1 %v2313_v21  ;;  %240 = vmatprep.subr.bf16.mxu0 %v2314_v22 }
  0x66   :  { %2283 = vmatprep.subr.bf16.mxu1 %v2314_v22 }
  0x67   :  { %114 = vadd.xlane.f32.xlu0 %v113_v5  ;;  %v2568_v5 = vmov 0.0  }
  0x68   :  { %241 = vmatpush1.bf16.msra.mxu0 %v2316_v23 }
  0x69   :  { %242 = vmatprep.subr.bf16.mxu0 %v2317_v24  ;;  %2287 = vmatpush1.bf16.msra.mxu1 %v2316_v23 }
  0x6a   :  { %2284 = vmatprep.subr.bf16.mxu1 %v2317_v24 }
  0x6c   :  { %243 = vmatpush1.bf16.msra.mxu0 %v2319_v27 }
  0x6d   :  { %2288 = vmatpush1.bf16.msra.mxu1 %v2319_v27  ;;  %2123 = vmatprep.subr.bf16.mxu0 %v2568_v5 }
  0x6e   :  { %2105 = vmatprep.subr.bf16.mxu1 %v2568_v5 }
  0xec   :  { %v109_v6 = vpop.xlane.xlu0 %108 }
  0xed   :  { %v120_v7 = vmul.f32 0.015625, %v109_v6 }
  0xef   :  { %v124_v8 = vsub.f32 %v100_v0, %v120_v7 }
  0xf0   :  { %v112_v9 = vpop.xlane.xlu0 %111 }
  0xf1   :  { %v121_v10 = vmul.f32 0.015625, %v112_v9  ;;  %v128_v11 = vmul.f32 %v124_v8, %v124_v8 }
  0xf3   :  { %v125_v12 = vsub.f32 %v101_v1, %v121_v10  ;;  %v132_v13 = vsel %vm106_vm0, %v128_v11, 0.0 }
  0xf4   :  { %133 = vadd.xlane.f32.xlu1 %v132_v13  ;;  %v115_v25 = vpop.xlane.xlu0 %114 }
  0xf5   :  { %v129_v14 = vmul.f32 %v125_v12, %v125_v12  ;;  %v122_v26 = vmul.f32 0.015625, %v115_v25 }
  0xf7   :  { %v135_v16 = vsel %vm106_vm0, %v129_v14, 0.0  ;;  %v126_v29 = vsub.f32 %v102_v4, %v122_v26 }
  0xf8   :  { %136 = vadd.xlane.f32.xlu1 %v135_v16 }
  0xf9   :  { %v130_v30 = vmul.f32 %v126_v29, %v126_v29 }
  0xfb   :  { %v138_v31 = vsel %vm106_vm0, %v130_v30, 0.0 }
  0xfc   :  { %117 = vadd.xlane.f32.xlu1 %v116_v17  ;;  %139 = vadd.xlane.f32.xlu0 %v138_v31 }
 0x181   :  { %v134_v32 = vpop.xlane.xlu1 %133 }
 0x182   :  { %v144_v33 = vmul.f32 0.015625, %v134_v32 }
 0x184   :  { %v148_v34 = vadd.f32 1e-05, %v144_v33 }
 0x185   :  { %v137_v35 = vpop.xlane.xlu1 %136 }
 0x186   :  { %2336 = vrsqrt.f32 %v148_v34  ;;  %v145_v36 = vmul.f32 0.015625, %v137_v35 }
 0x188   :  { %v149_v37 = vadd.f32 1e-05, %v145_v36 }
 0x189   :  { %v118_v38 = vpop.xlane.xlu1 %117  ;;  %v140_v54 = vpop.xlane.xlu0 %139 }
 0x18a   :  { %2338 = vrsqrt.f32 %v149_v37  ;;  %v123_v39 = vmul.f32 0.015625, %v118_v38  ;;  %v146_v55 = vmul.f32 0.015625, %v140_v54 }
 0x18c   :  { %v127_v40 = vsub.f32 %v103_v15, %v123_v39  ;;  %v150_v56 = vadd.f32 1e-05, %v146_v55 }
 0x18e   :  { %v131_v41 = vmul.f32 %v127_v40, %v127_v40  ;;  %2340 = vrsqrt.f32 %v150_v56 }
 0x190   :  { %v2337_v42 = vpop.eup %2336  ;;  %v141_v43 = vsel %vm106_vm0, %v131_v41, 0.0 }
 0x191   :  { %v156_v44 = vmul.f32 %v2337_v42, %v124_v8  ;;  %142 = vadd.xlane.f32.xlu1 %v141_v43 }
 0x193   :  { %v166_v48 = vmul.f32 %v1983_v45, %v156_v44 }
 0x194   :  { %v2339_v46 = vpop.eup %2338 }
 0x195   :  { %v157_v47 = vmul.f32 %v2339_v46, %v125_v12  ;;  %v176_v51 = vadd.f32 %v1984_v49, %v166_v48 }
 0x197   :  { %v167_v50 = vmul.f32 %v1983_v45, %v157_v47 }
 0x198   :  { %v2341_v60 = vpop.eup %2340 }
 0x199   :  { %v177_v52 = vadd.f32 %v1984_v49, %v167_v50  ;;  %v158_v61 = vmul.f32 %v2341_v60, %v126_v29 }
 0x19b   :  { %v188_v53 = vpack.c.bf16 %v177_v52, %v176_v51  ;;  %v168_v62 = vmul.f32 %v1983_v45, %v158_v61 }
 0x19d   :  { %1993 = vmatmul.mubr.msk.bf16.vlgmr.msra.gmra.mrb[0].mxu0 %vm106_vm0, %v188_v53  ;;  %v178_v2 = vadd.f32 %v1984_v49, %v168_v62  ;;  %v2823_v62 = vld [vmem:[%s3097_s2] sm:$0xff]  }
 0x19e   :  { %2125 = vmatprep.mubr.msk.bf16.mxu0 %vm2569_vm1, %v2568_v5 }
 0x21e   :  { %v143_v57 = vpop.xlane.xlu1 %142 }
 0x21f   :  { %v147_v58 = vmul.f32 0.015625, %v143_v57 }
 0x221   :  { %v151_v59 = vadd.f32 1e-05, %v147_v58 }
 0x223   :  { %2342 = vrsqrt.f32 %v151_v59 }
 0x22d   :  { %v2343_v63 = vpop.eup %2342 }
 0x22e   :  { %v159_v0 = vmul.f32 %v2343_v63, %v127_v40  ;;  %v2828_v63 = vld [vmem:[%s3097_s2 + $0x8] sm:$0xff]  }
 0x230   :  { %v169_v1 = vmul.f32 %v1983_v45, %v159_v0 }
 0x232   :  { %v179_v3 = vadd.f32 %v1984_v49, %v169_v1 }
 0x234   :  { %v189_v4 = vpack.c.bf16 %v179_v3, %v178_v2 }
 0x236   :  { %1994 = vmatmul.mubr.msk.bf16.vlgmr.msra.gmra.mrb[0].mxu1 %vm106_vm0, %v189_v4 }
 0x237   :  { %2107 = vmatprep.mubr.msk.bf16.mxu1 %vm2569_vm1, %v2568_v5 }
 0x270   :  { %v270_v6 = vpop.f32.mrb[0].mxu0 }
 0x271   :  { %v272_v7 = vpop.f32.mrb[1].mxu0 }
 0x272   :  { %v274_v8 = vpop.f32.mrb[2].mxu0 }
 0x273   :  { %v2766_v9 = vpack.c.bf16 %v274_v8, %v270_v6  ;;  %v276_v10 = vpop.f32.mrb[3].mxu0 }
 0x274   :  { %v2768_v11 = vpack.c.bf16 %v276_v10, %v272_v7 }
 0x275   :  { %300 = vrot.lane.b32.xlu0 %v2766_v9, %s2564_s5 }
 0x279   :  { %418 = vrot.lane.b32.xlu0 %v2766_v9, %s2570_s3 }
 0x2e7   :  { %v301_v12 = vpop.permute.xlu0 %300 }
 0x2e8   :  { %v307_v13 = vsel %vm302_vm2, %v301_v12, 0 }
 0x2e9   :  { %2106 = vmatpush3.bf16.xpose.msra.mxu1 %v307_v13 }
 0x2ea   :  { %2111 = vmatprep.subr.bf16.mxu1 %v2568_v5 }
 0x2eb   :  { %v419_v37 = vpop.permute.xlu0 %418 }
 0x2f0   :  { %2108 = vmatmul.mubr.msk.bf16.vlgmr.msra.gmra.mrb[4].mxu1 %vm302_vm2, %v2766_v9 }
 0x2f1   :  { %2112 = vmatpush3.bf16.msra.mxu1 %v2768_v11  ;;  %2113 = vmatprep.mubr.msk.bf16.mxu1 %vm2569_vm1, %v2568_v5 }
 0x2f2   :  { %2117 = vmatprep.subr.bf16.mxu1 %v2568_v5 }
 0x309   :  { %v280_v14 = vpop.f32.mrb[0].mxu1 }
 0x30a   :  { %v282_v15 = vpop.f32.mrb[1].mxu1 }
 0x30b   :  { %v284_v16 = vpop.f32.mrb[2].mxu1 }
 0x30c   :  { %v2782_v17 = vpack.c.bf16 %v284_v16, %v280_v14  ;;  %v286_v18 = vpop.f32.mrb[3].mxu1 }
 0x30d   :  { %v2784_v19 = vpack.c.bf16 %v286_v18, %v282_v15 }
 0x3c3   :  { %v343_v20 = vpop.f32.mrb[4].mxu1 }
 0x3c4   :  { %v2109_v21 = vpop.f32.mrb[5].mxu1  ;;  %v350_v22 = vsel %vm302_vm2, %v343_v20, -inf }
 0x3c5   :  { %351 = vmax.xlane.f32.xlu1 %v350_v22  ;;  %v346_v23 = vpop.f32.mrb[6].mxu1 }
 0x3c6   :  { %v2110_v24 = vpop.f32.mrb[7].mxu1  ;;  %v353_v25 = vsel %vm302_vm2, %v346_v23, -inf }
 0x3c9   :  { %354 = vmax.xlane.f32.xlu1 %v353_v25 }
 0x3da   :  { %420 = vrot.lane.b32.xlu1 %v2766_v9, %s2571_s4 }
 0x452   :  { %v352_v26 = vpop.xlane.xlu1 %351 }
 0x453   :  { %v356_v27 = vsub.f32 %v343_v20, %v352_v26 }
 0x455   :  { %v358_v28 = vmul.f32 1.442695, %v356_v27 }
 0x456   :  { %v355_v29 = vpop.xlane.xlu1 %354 }
 0x457   :  { %v357_v30 = vsub.f32 %v346_v23, %v355_v29  ;;  %2344 = vpow2.f32 %v358_v28 }
 0x459   :  { %v360_v31 = vmul.f32 1.442695, %v357_v30 }
 0x45a   :  { %v421_v34 = vpop.permute.xlu1 %420 }
 0x45b   :  { %2346 = vpow2.f32 %v360_v31  ;;  %v426_v36 = vsel %vm302_vm2, %v421_v34, 0 }
 0x461   :  { %v2345_v32 = vpop.eup %2344 }
 0x462   :  { %v362_v48 = vsel %vm302_vm2, %v2345_v32, 0.0 }
 0x465   :  { %v2347_v33 = vpop.eup %2346 }
 0x466   :  { %v370_v35 = vpack.c.bf16 %v2347_v33, %v2345_v32  ;;  %v365_v61 = vsel %vm302_vm2, %v2347_v33, 0.0 }
 0x468   :  { %2114 = vmatmul.mubr.msk.bf16.vlgmr.msra.gmra.mrb[8].mxu1 %vm302_vm2, %v370_v35 }
 0x469   :  { %2118 = vmatpush3.bf16.xpose.msra.mxu1 %v426_v36  ;;  %2119 = vmatprep.mubr.msk.bf16.mxu1 %vm2569_vm1, %v2568_v5 }
 0x46a   :  { %2129 = vmatprep.subr.bf16.mxu1 %v2568_v5 }
 0x470   :  { %2120 = vmatmul.mubr.msk.bf16.vlgmr.msra.gmra.mrb[12].mxu1 %vm302_vm2, %v419_v37 }
 0x471   :  { %2131 = vmatprep.mubr.msk.bf16.mxu1 %vm2569_vm1, %v2568_v5  ;;  %2130 = vmatpush3.bf16.msra.mxu1 %v2828_v63 }
 0x472   :  { %2141 = vmatprep.subr.bf16.mxu1 %v2568_v5 }
 0x53b   :  { %v2798_v38 = vpop.f32.mrb[8].mxu1 }
 0x53c   :  { %v2115_v39 = vpop.f32.mrb[9].mxu1 }
 0x53d   :  { %v411_v40 = vpop.f32.mrb[10].mxu1 }
 0x53e   :  { %v2116_v41 = vpop.f32.mrb[11].mxu1 }
 0x543   :  { %v462_v42 = vpop.f32.mrb[12].mxu1 }
 0x544   :  { %v2121_v43 = vpop.f32.mrb[13].mxu1  ;;  %v469_v44 = vsel %vm302_vm2, %v462_v42, -inf }
 0x545   :  { %470 = vmax.xlane.f32.xlu1 %v469_v44  ;;  %v465_v45 = vpop.f32.mrb[14].mxu1 }
 0x546   :  { %v2122_v46 = vpop.f32.mrb[15].mxu1  ;;  %v472_v47 = vsel %vm302_vm2, %v465_v45, -inf }
 0x547   :  { %473 = vmax.xlane.f32.xlu0 %v472_v47 }
 0x55d   :  { %491 = vrot.lane.b32.xlu0 %v2768_v11, %s2570_s3 }
 0x561   :  { %641 = vrot.lane.b32.xlu0 %v2766_v9, %s2572_s10 }
 0x580   :  { %363 = vadd.xlane.f32.xlu0 %v362_v48 }
 0x5d2   :  { %v471_v49 = vpop.xlane.xlu1 %470 }
 0x5d3   :  { %v475_v50 = vsub.f32 %v462_v42, %v471_v49 }
 0x5d4   :  { %v474_v51 = vpop.xlane.xlu0 %473 }
 0x5d5   :  { %v477_v52 = vmul.f32 1.442695, %v475_v50  ;;  %v476_v53 = vsub.f32 %v465_v45, %v474_v51 }
 0x5d7   :  { %2348 = vpow2.f32 %v477_v52  ;;  %v479_v54 = vmul.f32 1.442695, %v476_v53 }
 0x5d8   :  { %v492_v55 = vpop.permute.xlu0 %491 }
 0x5d9   :  { %2350 = vpow2.f32 %v479_v54  ;;  %2124 = vmatpush3.bf16.msra.mxu0 %v492_v55 }
 0x5da   :  { %2135 = vmatprep.subr.bf16.mxu0 %v2568_v5 }
 0x5dc   :  { %v642_v2 = vpop.permute.xlu0 %641 }
 0x5e1   :  { %v2349_v56 = vpop.eup %2348 }
 0x5e2   :  { %v481_v57 = vsel %vm302_vm2, %v2349_v56, 0.0 }
 0x5e3   :  { %v2351_v58 = vpop.eup %2350  ;;  %482 = vadd.xlane.f32.xlu1 %v481_v57 }
 0x5e4   :  { %v489_v59 = vpack.c.bf16 %v2351_v58, %v2349_v56  ;;  %v484_v60 = vsel %vm302_vm2, %v2351_v58, 0.0  ;;  %v2874_v56 = vld [vmem:[%s3097_s2 + $0x10] sm:$0xff]  }
 0x5e6   :  { %2126 = vmatmul.mubr.msk.bf16.vlgmr.msra.gmra.mrb[4].mxu0 %vm302_vm2, %v489_v59 }
 0x5e7   :  { %485 = vadd.xlane.f32.xlu1 %v484_v60  ;;  %2137 = vmatprep.mubr.msk.bf16.mxu0 %vm2569_vm1, %v2568_v5 }
 0x5e8   :  { %2136 = vmatpush3.bf16.msra.mxu0 %v2823_v62 }
 0x5e9   :  { %2147 = vmatprep.subr.bf16.mxu0 %v2568_v5 }
 0x5f8   :  { %643 = vrot.lane.b32.xlu1 %v2766_v9, %s2573_s24 }
 0x60d   :  { %v364_v3 = vpop.xlane.xlu0 %363 }
 0x60e   :  { %2352 = vrcp.f32 %v364_v3 }
 0x618   :  { %v2353_v7 = vpop.eup %2352 }
 0x61c   :  { %366 = vadd.xlane.f32.xlu1 %v365_v61 }
 0x62d   :  { %817 = vrot.lane.b32.xlu1 %v2766_v9, %s2574_s26 }
 0x631   :  { %815 = vrot.lane.b32.xlu1 %v2766_v9, %s2575_s25  ;;  %v415_v9 = vmul.f32 %v2353_v7, %v2798_v38 }
 0x670   :  { %v483_v0 = vpop.xlane.xlu1 %482 }
 0x674   :  { %v486_v1 = vpop.xlane.xlu1 %485 }
 0x678   :  { %v644_v4 = vpop.permute.xlu1 %643 }
 0x679   :  { %v649_v24 = vsel %vm302_vm2, %v644_v4, 0 }
 0x6a9   :  { %v367_v6 = vpop.xlane.xlu1 %366 }
 0x6aa   :  { %2354 = vrcp.f32 %v367_v6 }
 0x6ab   :  { %2356 = vrcp.f32 %v483_v0 }
 0x6ac   :  { %2358 = vrcp.f32 %v486_v1 }
 0x6ad   :  { %v818_v51 = vpop.permute.xlu1 %817 }
 0x6ae   :  { %v823_v54 = vsel %vm302_vm2, %v818_v51, 0 }
 0x6b1   :  { %v816_v55 = vpop.permute.xlu1 %815 }
 0x6b4   :  { %v2355_v8 = vpop.eup %2354 }
 0x6b5   :  { %v416_v10 = vmul.f32 %v2355_v8, %v411_v40  ;;  %v2357_v14 = vpop.eup %2356 }
 0x6b6   :  { %v2359_v16 = vpop.eup %2358 }
 0x6b7   :  { %v417_v12 = vpack.c.bf16 %v416_v10, %v415_v9 }
 0x6b9   :  { %v531_v13 = vpop.f32.mrb[4].mxu0  ;;  %2138 = vmatmul.mubr.msk.bf16.vlgmr.msra.gmra.mrb[8].mxu0 %vm302_vm2, %v417_v12 }
 0x6ba   :  { %v2127_v15 = vpop.f32.mrb[5].mxu0  ;;  %2149 = vmatprep.mubr.msk.bf16.mxu0 %vm2569_vm1, %v2568_v5  ;;  %v538_v20 = vmul.f32 %v2357_v14, %v531_v13 }
 0x6bb   :  { %v534_v18 = vpop.f32.mrb[6].mxu0 }
 0x6bc   :  { %v539_v21 = vmul.f32 %v2359_v16, %v534_v18  ;;  %v2128_v22 = vpop.f32.mrb[7].mxu0 }
 0x6be   :  { %v540_v23 = vpack.c.bf16 %v539_v21, %v538_v20 }
 0x6c0   :  { %2132 = vmatmul.mubr.msk.bf16.vlgmr.msra.gmra.mrb[16].mxu1 %vm302_vm2, %v540_v23 }
 0x6c1   :  { %2142 = vmatpush3.bf16.xpose.msra.mxu1 %v649_v24  ;;  %2143 = vmatprep.mubr.msk.bf16.mxu1 %vm2569_vm1, %v2568_v5 }
 0x6c2   :  { %2153 = vmatprep.subr.bf16.mxu1 %v2568_v5 }
 0x6c8   :  { %2144 = vmatmul.mubr.msk.bf16.vlgmr.msra.gmra.mrb[20].mxu1 %vm302_vm2, %v642_v2 }
 0x6c9   :  { %2155 = vmatprep.mubr.msk.bf16.mxu1 %vm2569_vm1, %v2568_v5  ;;  %2154 = vmatpush3.bf16.msra.mxu1 %v2874_v56 }
 0x6ca   :  { %2165 = vmatprep.subr.bf16.mxu1 %v2568_v5 }
 0x78c   :  { %v634_v25 = vpop.f32.mrb[8].mxu0 }
 0x78d   :  { %v2139_v26 = vpop.f32.mrb[9].mxu0 }
 0x78e   :  { %v637_v27 = vpop.f32.mrb[10].mxu0 }
 0x78f   :  { %v2140_v28 = vpop.f32.mrb[11].mxu0 }
 0x793   :  { %v584_v29 = vpop.f32.mrb[16].mxu1 }
 0x794   :  { %v2846_v30 = vadd.f32 %v634_v25, %v584_v29  ;;  %v2133_v31 = vpop.f32.mrb[17].mxu1 }
 0x795   :  { %v587_v32 = vpop.f32.mrb[18].mxu1 }
 0x796   :  { %v2848_v33 = vadd.f32 %v637_v27, %v587_v32  ;;  %v2134_v34 = vpop.f32.mrb[19].mxu1 }
 0x79b   :  { %v685_v35 = vpop.f32.mrb[20].mxu1 }
 0x79c   :  { %v2145_v36 = vpop.f32.mrb[21].mxu1  ;;  %v692_v37 = vsel %vm302_vm2, %v685_v35, -inf }
 0x79d   :  { %693 = vmax.xlane.f32.xlu0 %v692_v37  ;;  %v688_v38 = vpop.f32.mrb[22].mxu1 }
 0x79e   :  { %v2146_v39 = vpop.f32.mrb[23].mxu1  ;;  %v695_v40 = vsel %vm302_vm2, %v688_v38, -inf }
 0x7a1   :  { %696 = vmax.xlane.f32.xlu0 %v695_v40  ;;  %v2913_v40 = vld [vmem:[%s3097_s2 + $0x18] sm:$0xff]  }
 0x7b7   :  { %713 = vrot.lane.b32.xlu0 %v2768_v11, %s2572_s10 }
 0x82a   :  { %v694_v41 = vpop.xlane.xlu0 %693 }
 0x82b   :  { %v698_v42 = vsub.f32 %v685_v35, %v694_v41 }
 0x82d   :  { %v700_v43 = vmul.f32 1.442695, %v698_v42 }
 0x82e   :  { %v697_v44 = vpop.xlane.xlu0 %696 }
 0x82f   :  { %2360 = vpow2.f32 %v700_v43  ;;  %v699_v45 = vsub.f32 %v688_v38, %v697_v44 }
 0x831   :  { %v702_v46 = vmul.f32 1.442695, %v699_v45 }
 0x832   :  { %v714_v47 = vpop.permute.xlu0 %713 }
 0x833   :  { %2362 = vpow2.f32 %v702_v46  ;;  %2148 = vmatpush3.bf16.msra.mxu0 %v714_v47 }
 0x834   :  { %2159 = vmatprep.subr.bf16.mxu0 %v2568_v5 }
 0x839   :  { %v2361_v48 = vpop.eup %2360 }
 0x83a   :  { %v704_v49 = vsel %vm302_vm2, %v2361_v48, 0.0 }
 0x83b   :  { %705 = vadd.xlane.f32.xlu1 %v704_v49 }
 0x83d   :  { %v2363_v50 = vpop.eup %2362 }
 0x83e   :  { %v707_v52 = vsel %vm302_vm2, %v2363_v50, 0.0  ;;  %v712_v53 = vpack.c.bf16 %v2363_v50, %v2361_v48 }
 0x83f   :  { %708 = vadd.xlane.f32.xlu0 %v707_v52 }
 0x840   :  { %2150 = vmatmul.mubr.msk.bf16.vlgmr.msra.gmra.mrb[12].mxu0 %vm302_vm2, %v712_v53 }
 0x841   :  { %2160 = vmatpush3.bf16.xpose.msra.mxu0 %v823_v54  ;;  %2161 = vmatprep.mubr.msk.bf16.mxu0 %vm2569_vm1, %v2568_v5 }
 0x842   :  { %2171 = vmatprep.subr.bf16.mxu0 %v2568_v5 }
 0x848   :  { %2162 = vmatmul.mubr.msk.bf16.vlgmr.msra.gmra.mrb[16].mxu0 %vm302_vm2, %v816_v55 }
 0x849   :  { %2173 = vmatprep.mubr.msk.bf16.mxu0 %vm2569_vm1, %v2568_v5  ;;  %2172 = vmatpush3.bf16.msra.mxu0 %v2913_v40 }
 0x84a   :  { %2183 = vmatprep.subr.bf16.mxu0 %v2568_v5 }
 0x84c   :  { %887 = vrot.lane.b32.xlu1 %v2768_v11, %s2575_s25 }
 0x850   :  { %1111 = vrot.lane.b32.xlu1 %v2782_v17, %s2571_s4 }
 0x854   :  { %1109 = vrot.lane.b32.xlu1 %v2782_v17, %s2570_s3 }
 0x8c8   :  { %v706_v57 = vpop.xlane.xlu1 %705 }
 0x8c9   :  { %2364 = vrcp.f32 %v706_v57 }
 0x8cc   :  { %v709_v58 = vpop.xlane.xlu0 %708  ;;  %v888_v6 = vpop.permute.xlu1 %887 }
 0x8cd   :  { %2366 = vrcp.f32 %v709_v58 }
 0x8d0   :  { %v1112_v29 = vpop.permute.xlu1 %1111 }
 0x8d1   :  { %v1117_v31 = vsel %vm302_vm2, %v1112_v29, 0 }
 0x8d3   :  { %v2365_v59 = vpop.eup %2364 }
 0x8d4   :  { %v1110_v32 = vpop.permute.xlu1 %1109 }
 0x8d7   :  { %v2367_v61 = vpop.eup %2366 }
 0x913   :  { %v753_v11 = vpop.f32.mrb[12].mxu0 }
 0x914   :  { %v2151_v60 = vpop.f32.mrb[13].mxu0  ;;  %v760_v1 = vmul.f32 %v2365_v59, %v753_v11 }
 0x915   :  { %v756_v0 = vpop.f32.mrb[14].mxu0 }
 0x916   :  { %v761_v2 = vmul.f32 %v2367_v61, %v756_v0  ;;  %v2152_v3 = vpop.f32.mrb[15].mxu0 }
 0x918   :  { %v762_v4 = vpack.c.bf16 %v761_v2, %v760_v1 }
 0x91a   :  { %2156 = vmatmul.mubr.msk.bf16.vlgmr.msra.gmra.mrb[24].mxu1 %vm302_vm2, %v762_v4 }
 0x91b   :  { %2166 = vmatpush3.bf16.msra.mxu1 %v888_v6  ;;  %v859_v7 = vpop.f32.mrb[16].mxu0  ;;  %2167 = vmatprep.mubr.msk.bf16.mxu1 %vm2569_vm1, %v2568_v5 }
 0x91c   :  { %v2163_v8 = vpop.f32.mrb[17].mxu0  ;;  %v866_v9 = vsel %vm302_vm2, %v859_v7, -inf  ;;  %2177 = vmatprep.subr.bf16.mxu1 %v2568_v5 }
 0x91d   :  { %867 = vmax.xlane.f32.xlu0 %v866_v9  ;;  %v862_v10 = vpop.f32.mrb[18].mxu0 }
 0x91e   :  { %v2164_v12 = vpop.f32.mrb[19].mxu0  ;;  %v869_v13 = vsel %vm302_vm2, %v862_v10, -inf }
 0x921   :  { %870 = vmax.xlane.f32.xlu0 %v869_v13 }
 0x937   :  { %992 = vrot.lane.b32.xlu0 %v2782_v17, %s2564_s5 }
 0x9aa   :  { %v868_v14 = vpop.xlane.xlu0 %867 }
 0x9ab   :  { %v872_v15 = vsub.f32 %v859_v7, %v868_v14 }
 0x9ad   :  { %v874_v16 = vmul.f32 1.442695, %v872_v15 }
 0x9ae   :  { %v871_v18 = vpop.xlane.xlu0 %870 }
 0x9af   :  { %2368 = vpow2.f32 %v874_v16  ;;  %v873_v20 = vsub.f32 %v862_v10, %v871_v18 }
 0x9b1   :  { %v876_v21 = vmul.f32 1.442695, %v873_v20 }
 0x9b2   :  { %v993_v25 = vpop.permute.xlu0 %992 }
 0x9b3   :  { %2370 = vpow2.f32 %v876_v21  ;;  %v998_v28 = vsel %vm302_vm2, %v993_v25, 0 }
 0x9b9   :  { %v2369_v22 = vpop.eup %2368 }
 0x9ba   :  { %v878_v23 = vsel %vm302_vm2, %v2369_v22, 0.0 }
 0x9bb   :  { %879 = vadd.xlane.f32.xlu1 %v878_v23 }
 0x9bd   :  { %v2371_v24 = vpop.eup %2370 }
 0x9be   :  { %v881_v26 = vsel %vm302_vm2, %v2371_v24, 0.0  ;;  %v886_v27 = vpack.c.bf16 %v2371_v24, %v2369_v22 }
 0x9bf   :  { %882 = vadd.xlane.f32.xlu0 %v881_v26 }
 0x9c0   :  { %2168 = vmatmul.mubr.msk.bf16.vlgmr.msra.gmra.mrb[28].mxu1 %vm302_vm2, %v886_v27 }
 0x9c1   :  { %2178 = vmatpush3.bf16.xpose.msra.mxu1 %v998_v28  ;;  %2179 = vmatprep.mubr.msk.bf16.mxu1 %vm2569_vm1, %v2568_v5 }
 0x9c2   :  { %2189 = vmatprep.subr.bf16.mxu1 %v2568_v5 }
 0x9c8   :  { %2180 = vmatmul.mubr.msk.bf16.vlgmr.msra.gmra.mrb[32].mxu1 %vm302_vm2, %v2782_v17 }
 0x9c9   :  { %2190 = vmatpush3.bf16.xpose.msra.mxu1 %v1117_v31  ;;  %2191 = vmatprep.mubr.msk.bf16.mxu1 %vm2569_vm1, %v2568_v5 }
 0x9ca   :  { %2201 = vmatprep.subr.bf16.mxu1 %v2568_v5 }
 0x9d0   :  { %2192 = vmatmul.mubr.msk.bf16.vlgmr.msra.gmra.mrb[36].mxu1 %vm302_vm2, %v1110_v32 }
 0x9d1   :  { %2202 = vmatpush3.bf16.msra.mxu1 %v2828_v63  ;;  %2203 = vmatprep.mubr.msk.bf16.mxu1 %vm2569_vm1, %v2568_v5 }
 0x9d2   :  { %2213 = vmatprep.subr.bf16.mxu1 %v2568_v5 }
 0x9ed   :  { %v806_v34 = vpop.f32.mrb[24].mxu1 }
 0x9ee   :  { %v2905_v35 = vadd.f32 %v806_v34, %v2846_v30  ;;  %v2157_v36 = vpop.f32.mrb[25].mxu1 }
 0x9ef   :  { %v809_v37 = vpop.f32.mrb[26].mxu1 }
 0x9f0   :  { %v2908_v38 = vadd.f32 %v809_v37, %v2848_v33  ;;  %v2158_v39 = vpop.f32.mrb[27].mxu1 }
 0xa48   :  { %v880_v63 = vpop.xlane.xlu1 %879 }
 0xa49   :  { %2372 = vrcp.f32 %v880_v63 }
 0xa4c   :  { %v883_v41 = vpop.xlane.xlu0 %882 }
 0xa4d   :  { %2374 = vrcp.f32 %v883_v41 }
 0xa53   :  { %v2373_v42 = vpop.eup %2372 }
 0xa57   :  { %v2375_v44 = vpop.eup %2374 }
 0xa93   :  { %v927_v30 = vpop.f32.mrb[28].mxu1 }
 0xa94   :  { %v2169_v43 = vpop.f32.mrb[29].mxu1  ;;  %v934_v45 = vmul.f32 %v2373_v42, %v927_v30 }
 0xa95   :  { %v930_v33 = vpop.f32.mrb[30].mxu1 }
 0xa96   :  { %v935_v46 = vmul.f32 %v2375_v44, %v930_v33  ;;  %v2170_v47 = vpop.f32.mrb[31].mxu1 }
 0xa98   :  { %v936_v48 = vpack.c.bf16 %v935_v46, %v934_v45 }
 0xa9a   :  { %2174 = vmatmul.mubr.msk.bf16.vlgmr.msra.gmra.mrb[20].mxu0 %vm302_vm2, %v936_v48 }
 0xa9b   :  { %2184 = vmatpush3.bf16.msra.mxu0 %v2784_v19  ;;  %v1034_v49 = vpop.f32.mrb[32].mxu1  ;;  %2185 = vmatprep.mubr.msk.bf16.mxu0 %vm2569_vm1, %v2568_v5 }
 0xa9c   :  { %v2181_v50 = vpop.f32.mrb[33].mxu1  ;;  %v1041_v51 = vsel %vm302_vm2, %v1034_v49, -inf  ;;  %2195 = vmatprep.subr.bf16.mxu0 %v2568_v5 }
 0xa9d   :  { %1042 = vmax.xlane.f32.xlu0 %v1041_v51  ;;  %v1037_v52 = vpop.f32.mrb[34].mxu1 }
 0xa9e   :  { %v2182_v53 = vpop.f32.mrb[35].mxu1  ;;  %v1044_v54 = vsel %vm302_vm2, %v1037_v52, -inf }
 0xaa1   :  { %1045 = vmax.xlane.f32.xlu0 %v1044_v54 }
 0xaa3   :  { %v1153_v55 = vpop.f32.mrb[36].mxu1 }
 0xaa4   :  { %v2193_v57 = vpop.f32.mrb[37].mxu1  ;;  %v1160_v58 = vsel %vm302_vm2, %v1153_v55, -inf }
 0xaa5   :  { %1161 = vmax.xlane.f32.xlu1 %v1160_v58  ;;  %v1156_v11 = vpop.f32.mrb[38].mxu1 }
 0xaa6   :  { %v2194_v59 = vpop.f32.mrb[39].mxu1  ;;  %v1163_v60 = vsel %vm302_vm2, %v1156_v11, -inf }
 0xaa7   :  { %1164 = vmax.xlane.f32.xlu0 %v1163_v60 }
 0xab6   :  { %1182 = vrot.lane.b32.xlu1 %v2784_v19, %s2570_s3 }
 0xaba   :  { %1320 = vrot.lane.b32.xlu1 %v2782_v17, %s2572_s10 }
 0xb2a   :  { %v1043_v61 = vpop.xlane.xlu0 %1042 }
 0xb2b   :  { %v1047_v0 = vsub.f32 %v1034_v49, %v1043_v61 }
 0xb2d   :  { %v1049_v1 = vmul.f32 1.442695, %v1047_v0 }
 0xb2e   :  { %v1046_v2 = vpop.xlane.xlu0 %1045 }
 0xb2f   :  { %2376 = vpow2.f32 %v1049_v1  ;;  %v1048_v3 = vsub.f32 %v1037_v52, %v1046_v2 }
 0xb31   :  { %v1051_v4 = vmul.f32 1.442695, %v1048_v3 }
 0xb32   :  { %v1162_v6 = vpop.xlane.xlu1 %1161 }
 0xb33   :  { %2378 = vpow2.f32 %v1051_v4  ;;  %v1166_v7 = vsub.f32 %v1153_v55, %v1162_v6 }
 0xb34   :  { %v1165_v8 = vpop.xlane.xlu0 %1164 }
 0xb35   :  { %v1168_v9 = vmul.f32 1.442695, %v1166_v7  ;;  %v1167_v10 = vsub.f32 %v1156_v11, %v1165_v8 }
 0xb36   :  { %v1183_v18 = vpop.permute.xlu1 %1182 }
 0xb37   :  { %2380 = vpow2.f32 %v1168_v9  ;;  %v1170_v12 = vmul.f32 1.442695, %v1167_v10 }
 0xb39   :  { %v2377_v13 = vpop.eup %2376  ;;  %2382 = vpow2.f32 %v1170_v12 }
 0xb3a   :  { %v1053_v14 = vsel %vm302_vm2, %v2377_v13, 0.0  ;;  %v1321_v36 = vpop.permute.xlu1 %1320 }
 0xb3b   :  { %1054 = vadd.xlane.f32.xlu1 %v1053_v14 }
 0xb3d   :  { %v2379_v15 = vpop.eup %2378 }
 0xb3e   :  { %v1061_v16 = vpack.c.bf16 %v2379_v15, %v2377_v13 }
 0xb40   :  { %2186 = vmatmul.mubr.msk.bf16.vlgmr.msra.gmra.mrb[24].mxu0 %vm302_vm2, %v1061_v16 }
 0xb41   :  { %v2381_v20 = vpop.eup %2380  ;;  %2196 = vmatpush3.bf16.msra.mxu0 %v1183_v18  ;;  %2197 = vmatprep.mubr.msk.bf16.mxu0 %vm2569_vm1, %v2568_v5 }
 0xb42   :  { %v1172_v21 = vsel %vm302_vm2, %v2381_v20, 0.0  ;;  %2207 = vmatprep.subr.bf16.mxu0 %v2568_v5 }
 0xb43   :  { %v2383_v22 = vpop.eup %2382  ;;  %1173 = vadd.xlane.f32.xlu0 %v1172_v21 }
 0xb44   :  { %v1180_v23 = vpack.c.bf16 %v2383_v22, %v2381_v20  ;;  %v1175_v24 = vsel %vm302_vm2, %v2383_v22, 0.0 }
 0xb47   :  { %1176 = vadd.xlane.f32.xlu0 %v1175_v24 }
 0xb48   :  { %2198 = vmatmul.mubr.msk.bf16.vlgmr.msra.gmra.mrb[28].mxu0 %vm302_vm2, %v1180_v23 }
 0xb49   :  { %2208 = vmatpush3.bf16.msra.mxu0 %v2823_v62  ;;  %2209 = vmatprep.mubr.msk.bf16.mxu0 %vm2569_vm1, %v2568_v5  ;;  %v1056_v62 = vsel %vm302_vm2, %v2379_v15, 0.0 }
 0xb4a   :  { %2219 = vmatprep.subr.bf16.mxu0 %v2568_v5 }
 0xb5d   :  { %1322 = vrot.lane.b32.xlu0 %v2782_v17, %s2573_s24 }
 0xb6d   :  { %v980_v25 = vpop.f32.mrb[20].mxu0 }
 0xb6e   :  { %v2945_v26 = vadd.f32 %v980_v25, %v2905_v35  ;;  %v2175_v27 = vpop.f32.mrb[21].mxu0 }
 0xb6f   :  { %v983_v28 = vpop.f32.mrb[22].mxu0 }
 0xb70   :  { %v2948_v29 = vadd.f32 %v983_v28, %v2908_v38  ;;  %v2176_v31 = vpop.f32.mrb[23].mxu0 }
 0xb7c   :  { %1057 = vadd.xlane.f32.xlu0 %v1056_v62 }
 0xb92   :  { %1392 = vrot.lane.b32.xlu0 %v2784_v19, %s2572_s10 }
 0xbc8   :  { %v1055_v39 = vpop.xlane.xlu1 %1054 }
 0xbd0   :  { %v1174_v32 = vpop.xlane.xlu0 %1173 }
 0xbd4   :  { %v1177_v34 = vpop.xlane.xlu0 %1176 }
 0xbd8   :  { %v1323_v37 = vpop.permute.xlu0 %1322 }
 0xbd9   :  { %v1328_v57 = vsel %vm302_vm2, %v1323_v37, 0 }
 0xc09   :  { %v1058_v63 = vpop.xlane.xlu0 %1057 }
 0xc0a   :  { %2384 = vrcp.f32 %v1058_v63 }
 0xc0b   :  { %2386 = vrcp.f32 %v1055_v39 }
 0xc0c   :  { %2388 = vrcp.f32 %v1174_v32 }
 0xc0d   :  { %2390 = vrcp.f32 %v1177_v34  ;;  %v1393_v46 = vpop.permute.xlu0 %1392 }
 0xc13   :  { %v1099_v35 = vpop.f32.mrb[24].mxu0 }
 0xc14   :  { %v2385_v38 = vpop.eup %2384  ;;  %v2187_v41 = vpop.f32.mrb[25].mxu0 }
 0xc15   :  { %v2387_v30 = vpop.eup %2386  ;;  %v1102_v42 = vpop.f32.mrb[26].mxu0 }
 0xc16   :  { %v1106_v43 = vmul.f32 %v2387_v30, %v1099_v35  ;;  %v1107_v44 = vmul.f32 %v2385_v38, %v1102_v42  ;;  %v2188_v33 = vpop.f32.mrb[27].mxu0  ;;  %v2389_v48 = vpop.eup %2388 }
 0xc17   :  { %v2391_v50 = vpop.eup %2390 }
 0xc18   :  { %v1108_v45 = vpack.c.bf16 %v1107_v44, %v1106_v43 }
 0xc1a   :  { %2210 = vmatmul.mubr.msk.bf16.vlgmr.msra.gmra.mrb[32].mxu0 %vm302_vm2, %v1108_v45 }
 0xc1b   :  { %2220 = vmatpush3.bf16.msra.mxu0 %v1393_v46  ;;  %v1222_v47 = vpop.f32.mrb[28].mxu0  ;;  %2221 = vmatprep.mubr.msk.bf16.mxu0 %vm2569_vm1, %v2568_v5 }
 0xc1c   :  { %v2199_v49 = vpop.f32.mrb[29].mxu0  ;;  %2231 = vmatprep.subr.bf16.mxu0 %v2568_v5  ;;  %v1229_v52 = vmul.f32 %v2389_v48, %v1222_v47 }
 0xc1d   :  { %v1225_v51 = vpop.f32.mrb[30].mxu0 }
 0xc1e   :  { %v1230_v53 = vmul.f32 %v2391_v50, %v1225_v51  ;;  %v2200_v54 = vpop.f32.mrb[31].mxu0 }
 0xc20   :  { %v1231_v55 = vpack.c.bf16 %v1230_v53, %v1229_v52  ;;  %v2416_v52 = vld [vmem:[%s3095_s0] sm:$0xff] }
 0xc21   :  { %v3000_v53 = vadd.f32 %v2416_v52, %v2945_v26 }
 0xc22   :  { %2204 = vmatmul.mubr.msk.bf16.vlgmr.msra.gmra.mrb[40].mxu1 %vm302_vm2, %v1231_v55 }
 0xc23   :  { %2214 = vmatpush3.bf16.xpose.msra.mxu1 %v1328_v57  ;;  %2215 = vmatprep.mubr.msk.bf16.mxu1 %vm2569_vm1, %v2568_v5  ;;  %v2417_v57 = vld [vmem:[%s3095_s0 + $0x8] sm:$0xff] }
 0xc24   :  { %2225 = vmatprep.subr.bf16.mxu1 %v2568_v5 }
 0xc2a   :  { %2216 = vmatmul.mubr.msk.bf16.vlgmr.msra.gmra.mrb[44].mxu1 %vm302_vm2, %v1321_v36 }
 0xc2b   :  { %2226 = vmatpush3.bf16.msra.mxu1 %v2874_v56  ;;  %2227 = vmatprep.mubr.msk.bf16.mxu1 %vm2569_vm1, %v2568_v5 }
 0xc2c   :  { %2237 = vmatprep.subr.bf16.mxu1 %v2568_v5 }
 0xced   :  { %v1313_v58 = vpop.f32.mrb[32].mxu0 }
 0xcee   :  { %v2211_v11 = vpop.f32.mrb[33].mxu0 }
 0xcef   :  { %v1316_v59 = vpop.f32.mrb[34].mxu0  ;;  %v1662_v11 = vsel %vm106_vm0, %v3000_v53, 0.0 }
 0xcf0   :  { %v2212_v60 = vpop.f32.mrb[35].mxu0 }
 0xcf5   :  { %v1269_v61 = vpop.f32.mrb[40].mxu1 }
 0xcf6   :  { %v2967_v0 = vadd.f32 %v1313_v58, %v1269_v61  ;;  %v2205_v1 = vpop.f32.mrb[41].mxu1  ;;  %v3008_v58 = vadd.f32 %v2417_v57, %v2948_v29 }
 0xcf7   :  { %v1272_v2 = vpop.f32.mrb[42].mxu1 }
 0xcf8   :  { %v2969_v3 = vadd.f32 %v1316_v59, %v1272_v2  ;;  %v2206_v4 = vpop.f32.mrb[43].mxu1  ;;  %v1665_v26 = vsel %vm106_vm0, %v3008_v58, 0.0 }
 0xcfd   :  { %v1364_v6 = vpop.f32.mrb[44].mxu1 }
 0xcfe   :  { %v2217_v7 = vpop.f32.mrb[45].mxu1  ;;  %v1371_v56 = vsel %vm302_vm2, %v1364_v6, -inf }
 0xcff   :  { %1372 = vmax.xlane.f32.xlu1 %v1371_v56  ;;  %v1367_v8 = vpop.f32.mrb[46].mxu1 }
 0xd00   :  { %v2218_v9 = vpop.f32.mrb[47].mxu1  ;;  %v1374_v10 = vsel %vm302_vm2, %v1367_v8, -inf }
 0xd03   :  { %1375 = vmax.xlane.f32.xlu1 %v1374_v10 }
 0xd14   :  { %1490 = vrot.lane.b32.xlu1 %v2782_v17, %s2574_s26 }
 0xd18   :  { %1488 = vrot.lane.b32.xlu1 %v2782_v17, %s2575_s25 }
 0xd8c   :  { %v1373_v12 = vpop.xlane.xlu1 %1372 }
 0xd8d   :  { %v1377_v13 = vsub.f32 %v1364_v6, %v1373_v12 }
 0xd8f   :  { %v1379_v14 = vmul.f32 1.442695, %v1377_v13 }
 0xd90   :  { %v1376_v15 = vpop.xlane.xlu1 %1375 }
 0xd91   :  { %2392 = vpow2.f32 %v1379_v14  ;;  %v1378_v16 = vsub.f32 %v1367_v8, %v1376_v15 }
 0xd93   :  { %v1381_v18 = vmul.f32 1.442695, %v1378_v16 }
 0xd94   :  { %v1491_v23 = vpop.permute.xlu1 %1490 }
 0xd95   :  { %2394 = vpow2.f32 %v1381_v18  ;;  %v1496_v17 = vsel %vm302_vm2, %v1491_v23, 0 }
 0xd98   :  { %v1489_v27 = vpop.permute.xlu1 %1488 }
 0xd9b   :  { %v2393_v20 = vpop.eup %2392 }
 0xd9c   :  { %v1383_v21 = vsel %vm302_vm2, %v2393_v20, 0.0 }
 0xd9d   :  { %1384 = vadd.xlane.f32.xlu1 %v1383_v21 }
 0xd9f   :  { %v2395_v22 = vpop.eup %2394 }
 0xda0   :  { %v1386_v24 = vsel %vm302_vm2, %v2395_v22, 0.0  ;;  %v1391_v25 = vpack.c.bf16 %v2395_v22, %v2393_v20 }
 0xda1   :  { %1387 = vadd.xlane.f32.xlu0 %v1386_v24 }
 0xda2   :  { %2222 = vmatmul.mubr.msk.bf16.vlgmr.msra.gmra.mrb[36].mxu0 %vm302_vm2, %v1391_v25  ;;  %v2418_v25 = vld [vmem:[%s3095_s0 + $0x10] sm:$0xff] }
 0xda3   :  { %2232 = vmatpush3.bf16.xpose.msra.mxu0 %v1496_v17  ;;  %2233 = vmatprep.mubr.msk.bf16.mxu0 %vm2569_vm1, %v2568_v5 }
 0xda4   :  { %2243 = vmatprep.subr.bf16.mxu0 %v2568_v5 }
 0xdaa   :  { %2234 = vmatmul.mubr.msk.bf16.vlgmr.msra.gmra.mrb[40].mxu0 %vm302_vm2, %v1489_v27 }
 0xdab   :  { %2244 = vmatpush3.bf16.msra.mxu0 %v2913_v40  ;;  %2245 = vmatprep.mubr.msk.bf16.mxu0 %vm2569_vm1, %v2568_v5 }
 0xdae   :  { %1560 = vrot.lane.b32.xlu1 %v2784_v19, %s2575_s25 }
 0xe2a   :  { %v1385_v28 = vpop.xlane.xlu1 %1384 }
 0xe2b   :  { %2396 = vrcp.f32 %v1385_v28 }
 0xe2e   :  { %v1388_v31 = vpop.xlane.xlu0 %1387  ;;  %v1561_v40 = vpop.permute.xlu1 %1560 }
 0xe2f   :  { %2398 = vrcp.f32 %v1388_v31  ;;  %v2419_v31 = vld [vmem:[%s3095_s0 + $0x18] sm:$0xff] }
 0xe35   :  { %v2397_v32 = vpop.eup %2396 }
 0xe39   :  { %v2399_v36 = vpop.eup %2398 }
 0xe75   :  { %v1432_v62 = vpop.f32.mrb[36].mxu0 }
 0xe76   :  { %v2223_v34 = vpop.f32.mrb[37].mxu0  ;;  %v1439_v39 = vmul.f32 %v2397_v32, %v1432_v62 }
 0xe77   :  { %v1435_v37 = vpop.f32.mrb[38].mxu0 }
 0xe78   :  { %v1440_v63 = vmul.f32 %v2399_v36, %v1435_v37  ;;  %v2224_v35 = vpop.f32.mrb[39].mxu0 }
 0xe7a   :  { %v1441_v38 = vpack.c.bf16 %v1440_v63, %v1439_v39 }
 0xe7c   :  { %2228 = vmatmul.mubr.msk.bf16.vlgmr.msra.gmra.mrb[48].mxu1 %vm302_vm2, %v1441_v38 }
 0xe7d   :  { %2238 = vmatpush3.bf16.msra.mxu1 %v1561_v40  ;;  %v1532_v41 = vpop.f32.mrb[40].mxu0  ;;  %2239 = vmatprep.mubr.msk.bf16.mxu1 %vm2569_vm1, %v2568_v5 }
 0xe7e   :  { %v2235_v19 = vpop.f32.mrb[41].mxu0  ;;  %v1539_v30 = vsel %vm302_vm2, %v1532_v41, -inf }
 0xe7f   :  { %1540 = vmax.xlane.f32.xlu0 %v1539_v30  ;;  %v1535_v42 = vpop.f32.mrb[42].mxu0 }
 0xe80   :  { %v2236_v43 = vpop.f32.mrb[43].mxu0  ;;  %v1542_v44 = vsel %vm302_vm2, %v1535_v42, -inf }
 0xe83   :  { %1543 = vmax.xlane.f32.xlu0 %v1542_v44 }
 0xf0c   :  { %v1541_v33 = vpop.xlane.xlu0 %1540 }
 0xf0d   :  { %v1545_v45 = vsub.f32 %v1532_v41, %v1541_v33 }
 0xf0f   :  { %v1547_v46 = vmul.f32 1.442695, %v1545_v45 }
 0xf10   :  { %v1544_v47 = vpop.xlane.xlu0 %1543 }
 0xf11   :  { %2400 = vpow2.f32 %v1547_v46  ;;  %v1546_v48 = vsub.f32 %v1535_v42, %v1544_v47 }
 0xf13   :  { %v1549_v49 = vmul.f32 1.442695, %v1546_v48 }
 0xf15   :  { %2402 = vpow2.f32 %v1549_v49 }
 0xf1b   :  { %v2401_v50 = vpop.eup %2400 }
 0xf1c   :  { %v1551_v5 = vsel %vm302_vm2, %v2401_v50, 0.0 }
 0xf1d   :  { %1552 = vadd.xlane.f32.xlu0 %v1551_v5 }
 0xf1f   :  { %v2403_v51 = vpop.eup %2402 }
 0xf20   :  { %v1554_v54 = vsel %vm302_vm2, %v2403_v51, 0.0  ;;  %v1559_v55 = vpack.c.bf16 %v2403_v51, %v2401_v50 }
 0xf21   :  { %1555 = vadd.xlane.f32.xlu0 %v1554_v54  ;;  %v2023_v54 = vld [vmem:[#allocation2] ss:$0 sm:$0xff] }
 0xf22   :  { %2240 = vmatmul.mubr.msk.bf16.vlgmr.msra.gmra.mrb[52].mxu1 %vm302_vm2, %v1559_v55 }
 0xf25   :  { %1663 = vadd.xlane.f32.xlu0 %v1662_v11 }
 0xf29   :  { %1666 = vadd.xlane.f32.xlu0 %v1665_v26  ;;  %v2024_v26 = vld [vmem:[#allocation5] ss:$0 sm:$0xff] }
 0xf4f   :  { %v1479_v59 = vpop.f32.mrb[48].mxu1 }
 0xf50   :  { %v1486_v60 = vadd.f32 %v1479_v59, %v2967_v0  ;;  %v2229_v61 = vpop.f32.mrb[49].mxu1 }
 0xf51   :  { %v1482_v1 = vpop.f32.mrb[50].mxu1 }
 0xf52   :  { %v1487_v2 = vadd.f32 %v1482_v1, %v2969_v3  ;;  %v2230_v4 = vpop.f32.mrb[51].mxu1 }
 0xf53   :  { %v2325_v4 = vld [vmem:[#allocation7 + $0x8] sm:$0xff]  }
 0xfaa   :  { %v1553_v6 = vpop.xlane.xlu0 %1552 }
 0xfab   :  { %2404 = vrcp.f32 %v1553_v6  ;;  %v2326_v6 = vld [vmem:[#allocation7 + $0x10] sm:$0xff]  }
 0xfae   :  { %v1556_v7 = vpop.xlane.xlu0 %1555 }
 0xfaf   :  { %2406 = vrcp.f32 %v1556_v7  ;;  %v2327_v7 = vld [vmem:[#allocation7 + $0x18] sm:$0xff]  }
 0xfb2   :  { %v1664_v0 = vpop.xlane.xlu0 %1663 }
 0xfb3   :  { %v1674_v16 = vmul.f32 0.015625, %v1664_v0 }
 0xfb5   :  { %v2405_v56 = vpop.eup %2404  ;;  %v1678_v23 = vsub.f32 %v3000_v53, %v1674_v16 }
 0xfb6   :  { %v1667_v18 = vpop.xlane.xlu0 %1666 }
 0xfb7   :  { %v1675_v24 = vmul.f32 0.015625, %v1667_v18  ;;  %v1682_v37 = vmul.f32 %v1678_v23, %v1678_v23 }
 0xfb9   :  { %v2407_v9 = vpop.eup %2406  ;;  %v1679_v34 = vsub.f32 %v3008_v58, %v1675_v24  ;;  %v1686_v39 = vsel %vm106_vm0, %v1682_v37, 0.0 }
 0xfbb   :  { %v1683_v63 = vmul.f32 %v1679_v34, %v1679_v34 }
 0xfbd   :  { %v1689_v35 = vsel %vm106_vm0, %v1683_v63, 0.0 }
 0xff5   :  { %v1600_v29 = vpop.f32.mrb[52].mxu1 }
 0xff6   :  { %v2241_v8 = vpop.f32.mrb[53].mxu1  ;;  %v1607_v12 = vmul.f32 %v2405_v56, %v1600_v29  ;;  %v2328_v29 = vld [vmem:[%s3104_s9] sm:$0xff]   ;;  %v2329_v56 = vld [vmem:[%s3104_s9 + $0x8] sm:$0xff]  }
 0xff7   :  { %v1603_v10 = vpop.f32.mrb[54].mxu1  ;;  %2261 = vmatprep.subr.bf16.mxu0 %v2328_v29  ;;  %v2330_v8 = vld [vmem:[%s3104_s9 + $0x10] sm:$0xff]  }
 0xff8   :  { %v1608_v13 = vmul.f32 %v2407_v9, %v1603_v10  ;;  %v2242_v14 = vpop.f32.mrb[55].mxu1  ;;  %v2331_v9 = vld [vmem:[%s3104_s9 + $0x18] sm:$0xff]   ;;  %v2332_v10 = vld [vmem:[%s3104_s9 + $0x20] sm:$0xff]  }
 0xffa   :  { %v1609_v15 = vpack.c.bf16 %v1608_v13, %v1607_v12  ;;  %v2333_v12 = vld [vmem:[%s3104_s9 + $0x28] sm:$0xff]  }
 0xffc   :  { %2246 = vmatmul.mubr.msk.bf16.vlgmr.msra.gmra.mrb[44].mxu0 %vm302_vm2, %v1609_v15 }
 0xffd   :  { %2262 = vmatpush3.bf16.msra.mxu0 %v2328_v29 }
 0xffe   :  { %2263 = vmatprep.subr.bf16.mxu0 %v2329_v56 }
0x1001   :  { %2264 = vmatpush3.bf16.msra.mxu0 %v2329_v56 }
0x1002   :  { %2265 = vmatprep.subr.bf16.mxu0 %v2330_v8 }
0x1005   :  { %2266 = vmatpush3.bf16.msra.mxu0 %v2330_v8 }
0x1006   :  { %2267 = vmatprep.subr.bf16.mxu0 %v2331_v9 }
0x1009   :  { %2268 = vmatpush3.bf16.msra.mxu0 %v2331_v9 }
0x100a   :  { %2269 = vmatprep.subr.bf16.mxu0 %v2332_v10 }
0x100d   :  { %2270 = vmatpush3.bf16.msra.mxu0 %v2332_v10 }
0x100e   :  { %2271 = vmatprep.subr.bf16.mxu0 %v2333_v12 }
0x1011   :  { %2272 = vmatpush3.bf16.msra.mxu0 %v2333_v12 }
0x10cf   :  { %v1647_v3 = vpop.f32.mrb[44].mxu0 }
0x10d0   :  { %v1654_v20 = vadd.f32 %v1647_v3, %v1486_v60  ;;  %v2247_v21 = vpop.f32.mrb[45].mxu0 }
0x10d1   :  { %v1650_v22 = vpop.f32.mrb[46].mxu0 }
0x10d2   :  { %v3021_v17 = vadd.f32 %v2418_v25, %v1654_v20  ;;  %v1655_v27 = vadd.f32 %v1650_v22, %v1487_v2  ;;  %v2248_v28 = vpop.f32.mrb[47].mxu0  ;;  %v2324_v2 = vld [vmem:[#allocation7] sm:$0xff]  }
0x10d3   :  { %2249 = vmatprep.subr.bf16.mxu1 %v2324_v2 }
0x10d4   :  { %v3026_v62 = vadd.f32 %v2419_v31, %v1655_v27  ;;  %v1668_v32 = vsel %vm106_vm0, %v3021_v17, 0.0  ;;  %2250 = vmatpush3.bf16.msra.mxu1 %v2324_v2  ;;  %v2334_v31 = vld [vmem:[%s3104_s9 + $0x30] sm:$0xff]  }
0x10d5   :  { %1669 = vadd.xlane.f32.xlu1 %v1668_v32  ;;  %2251 = vmatprep.subr.bf16.mxu1 %v2325_v4  ;;  %v2335_v32 = vld [vmem:[%s3104_s9 + $0x38] sm:$0xff]   ;;  %s2576_s9 = smov [#allocation11]  }
0x10d6   :  { %v1671_v36 = vsel %vm106_vm0, %v3026_v62, 0.0  ;;  %2273 = vmatprep.subr.bf16.mxu0 %v2334_v31  ;;  %s1969_s12 = sshll.u32 %s2576_s9, 4  ;;  %s1970_s12 = int_to_ptr.vmem [resolvable:$true] %s1969_s12 }
0x10d7   :  { %1672 = vadd.xlane.f32.xlu0 %v1671_v36  ;;  %2274 = vmatpush3.bf16.msra.mxu0 %v2334_v31  ;;  %s2530_s13 = scalar_lea.vmem %s1970_s12, 512  ;;  %p2535_p13 = scmp.lt.s32.totalorder %s1970_s12, %s1970_s12 }
0x10d8   :  { %2252 = vmatpush3.bf16.msra.mxu1 %v2325_v4  ;;  %2275 = vmatprep.subr.bf16.mxu0 %v2335_v32  ;;  %p2531_p12 = scmp.ne.s32.totalorder %s1970_s12, %s2530_s13  ;;  %p2536_p0 = scmp.lt.s32.totalorder %s2530_s13, %s2530_s13 }
0x10d9   :  { %2253 = vmatprep.subr.bf16.mxu1 %v2326_v6 }
0x10da   :  { %p2537_p1 = por %p2536_p0, %p2535_p13 }
0x10db   :  { %1687 = vadd.xlane.f32.xlu0 %v1686_v39  ;;  %2276 = vmatpush3.bf16.msra.mxu0 %v2335_v32 }
0x10dc   :  { %2254 = vmatpush3.bf16.msra.mxu1 %v2326_v6  ;;  %p2538_p2 = pnand %p2537_p1, %p2531_p12 }
0x10dd   :  { %2255 = vmatprep.subr.bf16.mxu1 %v2327_v7 }
0x10df   :  { %1690 = vadd.xlane.f32.xlu0 %v1689_v35 }
0x10e0   :  { %2256 = vmatpush3.bf16.msra.mxu1 %v2327_v7 }
0x1162   :  { %v1670_v38 = vpop.xlane.xlu1 %1669 }
0x1163   :  { %v1676_v40 = vmul.f32 0.015625, %v1670_v38 }
0x1164   :  { %v1673_v41 = vpop.xlane.xlu0 %1672 }
0x1165   :  { %v3036_v19 = vsub.f32 %v3021_v17, %v1676_v40  ;;  %v1677_v30 = vmul.f32 0.015625, %v1673_v41 }
0x1167   :  { %v3039_v42 = vsub.f32 %v3026_v62, %v1677_v30  ;;  %v1684_v43 = vmul.f32 %v3036_v19, %v3036_v19 }
0x1168   :  { %v1688_v44 = vpop.xlane.xlu0 %1687 }
0x1169   :  { %v1698_v33 = vmul.f32 0.015625, %v1688_v44  ;;  %v1692_v45 = vsel %vm106_vm0, %v1684_v43, 0.0  ;;  %v1685_v46 = vmul.f32 %v3039_v42, %v3039_v42 }
0x116a   :  { %1693 = vadd.xlane.f32.xlu0 %v1692_v45  ;;  %v2032_v45 = vld [vmem:[#allocation10] ss:$0 sm:$0xff] }
0x116b   :  { %v1702_v47 = vadd.f32 1e-05, %v1698_v33  ;;  %v1695_v50 = vsel %vm106_vm0, %v1685_v46, 0.0 }
0x116c   :  { %v1691_v48 = vpop.xlane.xlu0 %1690 }
0x116d   :  { %2408 = vrsqrt.f32 %v1702_v47  ;;  %v1699_v49 = vmul.f32 0.015625, %v1691_v48 }
0x116e   :  { %1696 = vadd.xlane.f32.xlu0 %v1695_v50 }
0x116f   :  { %v1703_v5 = vadd.f32 1e-05, %v1699_v49 }
0x1171   :  { %2410 = vrsqrt.f32 %v1703_v5 }
0x1177   :  { %v2409_v51 = vpop.eup %2408 }
0x1178   :  { %v1710_v52 = vmul.f32 %v2409_v51, %v1678_v23 }
0x117a   :  { %v1720_v11 = vmul.f32 %v2023_v54, %v1710_v52 }
0x117b   :  { %v2411_v55 = vpop.eup %2410 }
0x117c   :  { %v1711_v57 = vmul.f32 %v2411_v55, %v1679_v34  ;;  %v1730_v60 = vadd.f32 %v2024_v26, %v1720_v11  ;;  %v2025_v34 = vld [vmem:[#allocation8] ss:$0 sm:$0xff] }
0x117e   :  { %v1721_v59 = vmul.f32 %v2023_v54, %v1711_v57 }
0x1180   :  { %v1731_v61 = vadd.f32 %v2024_v26, %v1721_v59 }
0x1182   :  { %v1734_v1 = vpack.c.bf16 %v1731_v61, %v1730_v60 }
0x1184   :  { %2257 = vmatprep.mubr.msk.bf16.mxu1 %vm106_vm0, %v1734_v1 }
0x11f7   :  { %v1694_v13 = vpop.xlane.xlu0 %1693 }
0x11f8   :  { %v1700_v14 = vmul.f32 0.015625, %v1694_v13 }
0x11fa   :  { %v1704_v15 = vadd.f32 1e-05, %v1700_v14 }
0x11fb   :  { %v1697_v0 = vpop.xlane.xlu0 %1696 }
0x11fc   :  { %2412 = vrsqrt.f32 %v1704_v15  ;;  %v1701_v16 = vmul.f32 0.015625, %v1697_v0 }
0x11fe   :  { %v1705_v18 = vadd.f32 1e-05, %v1701_v16 }
0x1200   :  { %2414 = vrsqrt.f32 %v1705_v18 }
0x1206   :  { %v2413_v3 = vpop.eup %2412 }
0x1207   :  { %v1712_v20 = vmul.f32 %v2413_v3, %v3036_v19 }
0x1209   :  { %v1722_v22 = vmul.f32 %v2023_v54, %v1712_v20 }
0x120a   :  { %v2415_v21 = vpop.eup %2414 }
0x120b   :  { %v1713_v23 = vmul.f32 %v2415_v21, %v3039_v42  ;;  %v1732_v25 = vadd.f32 %v2024_v26, %v1722_v22 }
0x120d   :  { %v1723_v24 = vmul.f32 %v2023_v54, %v1713_v23 }
0x120f   :  { %v1733_v27 = vadd.f32 %v2024_v26, %v1723_v24 }
0x1211   :  { %v1735_v28 = vpack.c.bf16 %v1733_v27, %v1732_v25 }
0x1213   :  { %2258 = vmatmul.mubr.msk.bf16.vlgmr.msra.gmra.mrb[56].mxu1 %vm106_vm0, %v1735_v28 }
0x12e6   :  { %v2259_v36 = vpop.f32.mrb[56].mxu1 }
0x12e7   :  { %v1824_v37 = vadd.f32 %v2259_v36, %v2025_v34  ;;  %v1815_v39 = vpop.f32.mrb[57].mxu1 }
0x12e8   :  { %v1816_v63 = vadd.f32 %v2025_v34, %v1815_v39  ;;  %v2260_v35 = vpop.f32.mrb[58].mxu1 }
0x12e9   :  { %v1827_v38 = vadd.f32 %v2260_v35, %v2025_v34  ;;  %v1818_v40 = vpop.f32.mrb[59].mxu1  ;;  %v1832_v19 = vmax.f32 %v1824_v37, 0.0 }
0x12ea   :  { %v1819_v41 = vadd.f32 %v2025_v34, %v1818_v40  ;;  %v1830_v42 = vmax.f32 %v1816_v63, 0.0 }
0x12eb   :  { %v1833_v30 = vmax.f32 %v1827_v38, 0.0 }
0x12ec   :  { %v1831_v43 = vmax.f32 %v1819_v41, 0.0 }
0x12ed   :  { %v1835_v44 = vpack.c.bf16 %v1833_v30, %v1832_v19 }
0x12ee   :  { %v1834_v33 = vpack.c.bf16 %v1831_v43, %v1830_v42 }
0x12f0   :  { %2277 = vmatprep.mubr.bf16.mxu0 %v1834_v33 }
0x12f1   :  { %2278 = vmatmul.mubr.bf16.vlgmr.msra.gmra.mrb[48].mxu0 %v1835_v44 }
0x13c4   :  { %v2279_v46 = vpop.f32.mrb[48].mxu0 }
0x13c5   :  { %v1950_v47 = vadd.f32 %v2279_v46, %v2032_v45  ;;  %v1941_v48 = vpop.f32.mrb[49].mxu0 }
0x13c6   :  { %v1942_v49 = vadd.f32 %v2032_v45, %v1941_v48  ;;  %v2280_v50 = vpop.f32.mrb[50].mxu0 }
0x13c7   :  { %v1958_v5 = vadd.f32 %v1950_v47, %v3021_v17  ;;  %v1953_v51 = vadd.f32 %v2280_v50, %v2032_v45  ;;  %v1944_v52 = vpop.f32.mrb[51].mxu0 }
0x13c8   :  { %v1956_v54 = vadd.f32 %v1942_v49, %v3000_v53  ;;  %v1945_v55 = vadd.f32 %v2032_v45, %v1944_v52 }
0x13c9   :  { %1962 = vst.msk [vmem:[#allocation11 + $0x10] sm:$0xff] %vm106_vm0, %v1958_v5  ;;  %v1959_v57 = vadd.f32 %v1953_v51, %v3026_v62 }
0x13ca   :  { %1960 = vst.msk [vmem:[#allocation11] sm:$0xff] %vm106_vm0, %v1956_v54  ;;  %v1957_v11 = vadd.f32 %v1945_v55, %v3008_v58 }
0x13cb   :  { %1963 = vst.msk [vmem:[#allocation11 + $0x18] sm:$0xff] %vm106_vm0, %v1959_v57 }
0x13cc   :  { %1961 = vst.msk [vmem:[#allocation11 + $0x8] sm:$0xff] %vm106_vm0, %v1957_v11 }
0x13cd   :  { %2541 = shalt.err (!%p2538_p2)
}
0x13ce   :  { %s2542_s15 = scalar_lea.hbm %s3106_s11, 512 }
0x13cf   :  { %p2543_p3 = scmp.ne.s32.totalorder %s3106_s11, %s2542_s15  ;;  %p2546_p4 = scmp.lt.u32.totalorder %s2542_s15, %s3106_s11 }
0x13d1   :  { %p2548_p5 = pnand %p2546_p4, %p2543_p3 }
0x13d3   :  { %2551 = shalt.err (!%p2548_p5)
}
0x13d4   :  { %s2577_s17 = smov 128   ;;  %s2578_s19 = smov 8  }
0x13d5   :  { %1975 = dma.vmem_to_hbm [thread:$0]  %s1970_s12, 512, %s3106_s11, [#allocation4], %s2577_s17, %s2577_s17, %s2578_s19  }
0x13d6   :  { %2558 = dma.done.wait [#allocation4], 512  }
0x13d7   :  { %2559 = vsyncadd [#allocation4], 4294966784 }
0x13d8   :  { %1979 = vsyncpa [#allocation3], 1 }
0x13d9   :  { %1980 = vsyncpa [#allocation6], 1 }
0x13da   :  { %1981 = vsyncpa [#allocation9], 1 }
0x13db   :  { %1982 = vsyncpa [#allocation4], 1 }

</bundles_post_ra>
